<compile_context>
chip_gen: v5e
topology: v5e:2x2
jax: 0.10.0
libtpu: 0.0.40
codegen_flags: <defaults>
</compile_context>

<pallas_src>
import jax
import jax.numpy as jnp
from jax import lax
from jax.experimental import pallas as pl
from jax.experimental.pallas import tpu as pltpu

NUM_CLASSES = 4      # num_classes (no-object class is index NUM_CLASSES)
EOS_COEF = 0.1       # eos_coef


def _make_kernel(B, Q, T, L, num_classes, eos_coef):
    def kernel(logits_ref, boxes_ref, tinfo_ref, out_ref):
        # Scalar partial sums, accumulated across the (statically unrolled)
        # batch loop; only 2-D vector ops are used inside.
        s_wnll = 0.0     # sum of weight * nll           (loss_ce numerator)
        s_w = 0.0        # sum of weights                (loss_ce denominator)
        s_correct = 0.0  # matched & correctly classified (class_error)
        s_valid = 0.0    # number of valid targets       (num_boxes)
        s_card = 0.0     # sum_b |card_pred_b - tgt_len_b|
        s_l1 = 0.0       # sum of masked L1 box errors
        s_giou = 0.0     # sum of masked (1 - giou)

        for b in range(B):                       # static unroll, B is small
            lg = logits_ref[b]                   # [Q, L] f32
            bx = boxes_ref[b]                    # [Q, 4] f32
            ti = tinfo_ref[b]                    # [7, T] f32

            ms = ti[0:1, :]                      # matched query idx per target
            lbl = ti[1:2, :]                     # target label
            vld = ti[2:3, :]                     # valid flag (0/1)

            # hit[q, t] = 1 iff valid target t is matched to query q.
            q_iota = lax.broadcasted_iota(jnp.int32, (Q, T), 0)
            hit = jnp.where((q_iota == ms.astype(jnp.int32)) & (vld > 0.5),
                            1.0, 0.0)                                  # [Q, T]

            # ---- scatter: target class per query (exact {0,1} mask sums) ----
            has_match = jnp.sum(hit, axis=1, keepdims=True)            # [Q, 1]
            lbl_at = jnp.sum(hit * lbl, axis=1, keepdims=True)         # [Q, 1]
            tc = jnp.where(has_match > 0.5,
                           (lbl_at + 0.5).astype(jnp.int32),
                           num_classes)                                # [Q, 1]

            # ---- loss_labels: weighted cross-entropy over all Q queries ----
            mx = jnp.max(lg, axis=1, keepdims=True)                    # [Q, 1]
            lse = mx + jnp.log(jnp.sum(jnp.exp(lg - mx),
                                       axis=1, keepdims=True))
            cls_iota = lax.broadcasted_iota(jnp.int32, (Q, L), 1)
            logit_at = jnp.sum(jnp.where(cls_iota == tc, lg, 0.0),
                               axis=1, keepdims=True)
            nll = lse - logit_at
            w = jnp.where(tc == num_classes, eos_coef, 1.0)            # [Q, 1]
            s_wnll = s_wnll + jnp.sum(w * nll)
            s_w = s_w + jnp.sum(w)

            # Per-query argmax (first max), shared by cardinality & class_error.
            amax = jnp.min(jnp.where(lg == mx, cls_iota, L),
                           axis=1, keepdims=True)                      # [Q, 1]

            # ---- loss_cardinality ----
            card_pred = jnp.sum((amax != num_classes).astype(jnp.float32))
            tlen = jnp.sum(vld)
            s_card = s_card + jnp.abs(card_pred - tlen)

            # ---- class_error (query-axis form, no matched-logit gather) ----
            s_correct = s_correct + jnp.sum(
                jnp.where(amax == tc, 1.0, 0.0) * has_match)
            s_valid = s_valid + tlen

            # ---- loss_boxes: in-kernel gather of matched pred boxes ----
            sc = [jnp.sum(hit * bx[:, c:c + 1], axis=0, keepdims=True)
                  for c in range(4)]                                   # 4x[1,T]
            tcrd = [ti[3 + c:4 + c, :] for c in range(4)]              # 4x[1,T]

            l1 = (jnp.abs(sc[0] - tcrd[0]) + jnp.abs(sc[1] - tcrd[1])
                  + jnp.abs(sc[2] - tcrd[2]) + jnp.abs(sc[3] - tcrd[3]))
            s_l1 = s_l1 + jnp.sum(l1 * vld)

            sx0 = sc[0] - 0.5 * sc[2]
            sx1 = sc[0] + 0.5 * sc[2]
            sy0 = sc[1] - 0.5 * sc[3]
            sy1 = sc[1] + 0.5 * sc[3]
            tx0 = tcrd[0] - 0.5 * tcrd[2]
            tx1 = tcrd[0] + 0.5 * tcrd[2]
            ty0 = tcrd[1] - 0.5 * tcrd[3]
            ty1 = tcrd[1] + 0.5 * tcrd[3]

            area_s = (sx1 - sx0) * (sy1 - sy0)
            area_t = (tx1 - tx0) * (ty1 - ty0)
            iw = jnp.maximum(jnp.minimum(sx1, tx1) - jnp.maximum(sx0, tx0), 0.0)
            ih = jnp.maximum(jnp.minimum(sy1, ty1) - jnp.maximum(sy0, ty0), 0.0)
            inter = iw * ih
            union = area_s + area_t - inter
            cw = jnp.maximum(jnp.maximum(sx1, tx1) - jnp.minimum(sx0, tx0), 0.0)
            ch = jnp.maximum(jnp.maximum(sy1, ty1) - jnp.minimum(sy0, ty0), 0.0)
            area_c = cw * ch
            union_safe = jnp.where(vld > 0.5, union, 1.0)
            area_c_safe = jnp.where(vld > 0.5, area_c, 1.0)
            # Exact divides kept (approx reciprocal flagged as a tolerance risk).
            giou = inter / union_safe - (area_c - union) / area_c_safe
            s_giou = s_giou + jnp.sum((1.0 - giou) * vld)

        num_boxes = jnp.maximum(s_valid, 1.0)      # == clamp(sum valid, min=1)
        out_ref[0] = s_wnll / s_w                                  # loss_ce
        out_ref[1] = 100.0 - 100.0 * s_correct / num_boxes         # class_error
        out_ref[2] = s_card / B                                    # cardinality
        out_ref[3] = s_l1 / num_boxes                              # loss_bbox
        out_ref[4] = s_giou / num_boxes                            # loss_giou
        out_ref[5] = 0.0
        out_ref[6] = 0.0
        out_ref[7] = 0.0

    return kernel


def _forward_impl(pred_logits, pred_boxes, tgt_labels, tgt_boxes, tgt_valid,
                  match_src, num_classes, eos_coef):
    B, Q, L = pred_logits.shape
    T = tgt_labels.shape[1]

    # Single tiny target-info tensor (rows: match_src, label, valid, cx,cy,w,h),
    # lane-dense over T; fuses with the pallas_call under jit — no padded
    # HBM buffers are materialized.
    tinfo = jnp.concatenate(
        [match_src.astype(jnp.float32)[:, None, :],
         tgt_labels.astype(jnp.float32)[:, None, :],
         tgt_valid.astype(jnp.float32)[:, None, :],
         jnp.transpose(tgt_boxes.astype(jnp.float32), (0, 2, 1))],
        axis=1)                                                   # [B, 7, T]

    kernel = _make_kernel(B, Q, T, L, num_classes, eos_coef)
    vmem = pl.BlockSpec(memory_space=pltpu.MemorySpace.VMEM)
    smem = pl.BlockSpec(memory_space=pltpu.MemorySpace.SMEM)

    bytes_accessed = 4 * (pred_logits.size + pred_boxes.size + tinfo.size) + 32
    cost = pl.CostEstimate(
        flops=int(B * (30 * Q * T + 20 * Q * L + 80 * T)),
        transcendentals=int(B * Q * (L + 1)),
        bytes_accessed=int(bytes_accessed))

    out = pl.pallas_call(
        kernel,
        out_shape=jax.ShapeDtypeStruct((8,), jnp.float32),
        in_specs=[vmem, vmem, vmem],
        out_specs=smem,
        cost_estimate=cost,
    )(pred_logits.astype(jnp.float32), pred_boxes.astype(jnp.float32), tinfo)

    return {
        "loss_ce": out[0],
        "class_error": out[1],
        "cardinality_error": out[2],
        "loss_bbox": out[3],
        "loss_giou": out[4],
    }


_forward_jit = jax.jit(_forward_impl, static_argnums=(6, 7))


def set_criterion_forward(pred_logits, pred_boxes, tgt_labels, tgt_boxes,
                          tgt_valid, match_src,
                          num_classes=NUM_CLASSES, eos_coef=EOS_COEF):
    return _forward_jit(pred_logits, pred_boxes, tgt_labels, tgt_boxes,
                        tgt_valid, match_src, num_classes, eos_coef)


def reference_forward(pred_logits, pred_boxes, tgt_labels, tgt_boxes,
                      tgt_valid, match_src,
                      num_classes=NUM_CLASSES, eos_coef=EOS_COEF):
    """Pure-JAX reference mirroring the PyTorch SetCriterion semantics."""
    B, Q, L = pred_logits.shape
    T = tgt_labels.shape[1]

    q_iota = jnp.arange(Q, dtype=jnp.int32)
    hit = (match_src[:, :, None] == q_iota[None, None, :]) & tgt_valid[:, :, None]
    has_match = jnp.any(hit, axis=1)
    lbl_at_q = jnp.sum(jnp.where(hit, tgt_labels[:, :, None], 0), axis=1)
    target_classes = jnp.where(has_match, lbl_at_q, num_classes)

    empty_weight = jnp.ones((L,), jnp.float32).at[L - 1].set(eos_coef)
    logp = jax.nn.log_softmax(pred_logits, axis=-1)
    onehot = jax.nn.one_hot(target_classes, L)
    nll = -jnp.sum(onehot * logp, axis=-1)
    w = empty_weight[target_classes]
    loss_ce = jnp.sum(w * nll) / jnp.sum(w)

    amax = jnp.argmax(pred_logits, axis=-1)
    card_pred = jnp.sum((amax != L - 1).astype(jnp.float32), axis=-1)
    tgt_len = jnp.sum(tgt_valid, axis=1).astype(jnp.float32)
    card_err = jnp.mean(jnp.abs(card_pred - tgt_len))

    batch_idx = jnp.repeat(jnp.arange(B), T)
    src_flat = match_src.reshape(-1)
    valid = tgt_valid.reshape(-1).astype(jnp.float32)
    m_logits = pred_logits[batch_idx, src_flat]
    m_labels = tgt_labels.reshape(-1)
    m_amax = jnp.argmax(m_logits, axis=-1)
    correct = (m_amax == m_labels).astype(jnp.float32) * valid
    acc = 100.0 * jnp.sum(correct) / jnp.maximum(jnp.sum(valid), 1.0)
    class_error = 100.0 - acc

    num_boxes = jnp.maximum(jnp.sum(tgt_valid).astype(jnp.float32), 1.0)
    m_src = pred_boxes[batch_idx, src_flat]
    m_tgt = tgt_boxes.reshape(-1, 4)
    loss_bbox = jnp.sum(jnp.sum(jnp.abs(m_src - m_tgt), axis=-1) * valid) / num_boxes

    def to_xyxy(b):
        cx, cy, bw, bh = b[:, 0], b[:, 1], b[:, 2], b[:, 3]
        return jnp.stack([cx - bw / 2, cy - bh / 2, cx + bw / 2, cy + bh / 2], axis=-1)

    s = to_xyxy(m_src)
    t = to_xyxy(m_tgt)
    area_s = (s[:, 2] - s[:, 0]) * (s[:, 3] - s[:, 1])
    area_t = (t[:, 2] - t[:, 0]) * (t[:, 3] - t[:, 1])
    lt = jnp.maximum(s[:, :2], t[:, :2])
    rb = jnp.minimum(s[:, 2:], t[:, 2:])
    wh = jnp.clip(rb - lt, 0.0)
    inter = wh[:, 0] * wh[:, 1]
    union = area_s + area_t - inter
    iou = inter / jnp.where(valid > 0, union, 1.0)
    ltc = jnp.minimum(s[:, :2], t[:, :2])
    rbc = jnp.maximum(s[:, 2:], t[:, 2:])
    whc = jnp.clip(rbc - ltc, 0.0)
    areac = whc[:, 0] * whc[:, 1]
    giou = iou - (areac - union) / jnp.where(valid > 0, areac, 1.0)
    loss_giou = jnp.sum((1.0 - giou) * valid) / num_boxes

    return jnp.stack([loss_ce, class_error, card_err, loss_bbox, loss_giou])


if __name__ == "__main__":
    B, Q, T_MAX = 2, 8, 4
    L = NUM_CLASSES + 1

    key = jax.random.PRNGKey(0)
    k1, k2, k3, k4, k5 = jax.random.split(key, 5)
    pred_logits = jax.random.normal(k1, (B, Q, L), jnp.float32)
    pred_boxes = jax.nn.sigmoid(jax.random.normal(k2, (B, Q, 4), jnp.float32))
    tgt_labels = jax.random.randint(k3, (B, T_MAX), 0, NUM_CLASSES, dtype=jnp.int32)
    centers = jax.random.uniform(k4, (B, T_MAX, 2), minval=0.3, maxval=0.7)
    whs = jax.random.uniform(k5, (B, T_MAX, 2), minval=0.1, maxval=0.4)
    tgt_boxes = jnp.concatenate([centers, whs], axis=-1).astype(jnp.float32)
    tgt_valid = jnp.array([[1, 1, 1, 0], [1, 1, 0, 0]], dtype=bool)      # 3 + 2 targets
    # Precomputed matcher output (src query index per target slot).
    match_src = jnp.array([[0, 3, 5, 7], [2, 6, 0, 1]], dtype=jnp.int32)

    losses = set_criterion_forward(pred_logits, pred_boxes, tgt_labels,
                                   tgt_boxes, tgt_valid, match_src)
    jax.block_until_ready(losses)

    got = jnp.stack([losses["loss_ce"], losses["class_error"],
                     losses["cardinality_error"], losses["loss_bbox"],
                     losses["loss_giou"]])
    ref = reference_forward(pred_logits, pred_boxes, tgt_labels,
                            tgt_boxes, tgt_valid, match_src)
    assert jnp.allclose(got, ref, atol=1e-3, rtol=1e-3), (got, ref)

    print("KERNEL_OK")
</pallas_src>

<mosaic_0001>
module attributes {stable_mosaic.version = 11 : i64} {
  func.func @kernel(%arg0: memref<2x8x5xf32, #tpu.memory_space<vmem>>, %arg1: memref<2x8x4xf32, #tpu.memory_space<vmem>>, %arg2: memref<2x7x4xf32, #tpu.memory_space<vmem>>, %arg3: memref<8xf32, #tpu.memory_space<smem>>) attributes {dimension_semantics = [], scalar_prefetch = 0 : i64, scratch_operands = 0 : i64, tpu.core_type = #tpu.core_type<tc>} {
    %c0 = arith.constant 0 : index
    %c0_0 = arith.constant 0 : index
    %c0_1 = arith.constant 0 : index
    %0 = vector.load %arg0[%c0, %c0_0, %c0_1] : memref<2x8x5xf32, #tpu.memory_space<vmem>>, vector<1x8x5xf32>
    %1 = vector.shape_cast %0 : vector<1x8x5xf32> to vector<8x5xf32>
    %c0_2 = arith.constant 0 : index
    %c0_3 = arith.constant 0 : index
    %c0_4 = arith.constant 0 : index
    %2 = vector.load %arg1[%c0_2, %c0_3, %c0_4] : memref<2x8x4xf32, #tpu.memory_space<vmem>>, vector<1x8x4xf32>
    %3 = vector.shape_cast %2 : vector<1x8x4xf32> to vector<8x4xf32>
    %c0_5 = arith.constant 0 : index
    %c0_6 = arith.constant 0 : index
    %c0_7 = arith.constant 0 : index
    %4 = vector.load %arg2[%c0_5, %c0_6, %c0_7] : memref<2x7x4xf32, #tpu.memory_space<vmem>>, vector<1x7x4xf32>
    %5 = vector.shape_cast %4 : vector<1x7x4xf32> to vector<7x4xf32>
    %6 = vector.extract_strided_slice %5 {offsets = [0, 0], sizes = [1, 4], strides = [1, 1]} : vector<7x4xf32> to vector<1x4xf32>
    %7 = vector.extract_strided_slice %5 {offsets = [1, 0], sizes = [1, 4], strides = [1, 1]} : vector<7x4xf32> to vector<1x4xf32>
    %8 = vector.extract_strided_slice %5 {offsets = [2, 0], sizes = [1, 4], strides = [1, 1]} : vector<7x4xf32> to vector<1x4xf32>
    %9 = tpu.iota {dimensions = array<i32: 0>} : vector<8x4xi32>
    %10 = arith.fptosi %6 : vector<1x4xf32> to vector<1x4xi32>
    %11 = vector.broadcast %10 : vector<1x4xi32> to vector<8x4xi32>
    %12 = arith.cmpi eq, %9, %11 : vector<8x4xi32>
    %cst = arith.constant 5.000000e-01 : f32
    %13 = vector.broadcast %cst : f32 to vector<1x4xf32>
    %14 = arith.cmpf ogt, %8, %13 : vector<1x4xf32>
    %15 = vector.broadcast %14 : vector<1x4xi1> to vector<8x4xi1>
    %16 = arith.andi %12, %15 : vector<8x4xi1>
    %cst_8 = arith.constant 1.000000e+00 : f32
    %cst_9 = arith.constant 0.000000e+00 : f32
    %17 = vector.broadcast %cst_8 : f32 to vector<8x4xf32>
    %18 = vector.broadcast %cst_9 : f32 to vector<8x4xf32>
    %19 = arith.select %16, %17, %18 : vector<8x4xi1>, vector<8x4xf32>
    %cst_10 = arith.constant dense<0.000000e+00> : vector<8xf32>
    %20 = vector.multi_reduction <add>, %19, %cst_10 [1] : vector<8x4xf32> to vector<8xf32>
    %21 = vector.shape_cast %20 : vector<8xf32> to vector<8x1xf32>
    %22 = vector.broadcast %7 : vector<1x4xf32> to vector<8x4xf32>
    %23 = arith.mulf %19, %22 : vector<8x4xf32>
    %cst_11 = arith.constant dense<0.000000e+00> : vector<8xf32>
    %24 = vector.multi_reduction <add>, %23, %cst_11 [1] : vector<8x4xf32> to vector<8xf32>
    %25 = vector.shape_cast %24 : vector<8xf32> to vector<8x1xf32>
    %cst_12 = arith.constant 5.000000e-01 : f32
    %26 = vector.broadcast %cst_12 : f32 to vector<8x1xf32>
    %27 = arith.cmpf ogt, %21, %26 : vector<8x1xf32>
    %cst_13 = arith.constant 5.000000e-01 : f32
    %28 = vector.broadcast %cst_13 : f32 to vector<8x1xf32>
    %29 = arith.addf %25, %28 : vector<8x1xf32>
    %30 = arith.fptosi %29 : vector<8x1xf32> to vector<8x1xi32>
    %c4_i32 = arith.constant 4 : i32
    %31 = vector.broadcast %c4_i32 : i32 to vector<8x1xi32>
    %32 = arith.select %27, %30, %31 : vector<8x1xi1>, vector<8x1xi32>
    %cst_14 = arith.constant dense<0xFF800000> : vector<8xf32>
    %33 = vector.multi_reduction <maximumf>, %1, %cst_14 [1] : vector<8x5xf32> to vector<8xf32>
    %34 = vector.shape_cast %33 : vector<8xf32> to vector<8x1xf32>
    %35 = vector.broadcast %34 : vector<8x1xf32> to vector<8x5xf32>
    %36 = arith.subf %1, %35 : vector<8x5xf32>
    %37 = math.exp %36 : vector<8x5xf32>
    %cst_15 = arith.constant dense<0.000000e+00> : vector<8xf32>
    %38 = vector.multi_reduction <add>, %37, %cst_15 [1] : vector<8x5xf32> to vector<8xf32>
    %39 = vector.shape_cast %38 : vector<8xf32> to vector<8x1xf32>
    %40 = math.log %39 : vector<8x1xf32>
    %41 = arith.addf %34, %40 : vector<8x1xf32>
    %42 = tpu.iota {dimensions = array<i32: 1>} : vector<8x5xi32>
    %43 = vector.broadcast %32 : vector<8x1xi32> to vector<8x5xi32>
    %44 = arith.cmpi eq, %42, %43 : vector<8x5xi32>
    %cst_16 = arith.constant 0.000000e+00 : f32
    %45 = vector.broadcast %cst_16 : f32 to vector<8x5xf32>
    %46 = arith.select %44, %1, %45 : vector<8x5xi1>, vector<8x5xf32>
    %cst_17 = arith.constant dense<0.000000e+00> : vector<8xf32>
    %47 = vector.multi_reduction <add>, %46, %cst_17 [1] : vector<8x5xf32> to vector<8xf32>
    %48 = vector.shape_cast %47 : vector<8xf32> to vector<8x1xf32>
    %49 = arith.subf %41, %48 : vector<8x1xf32>
    %c4_i32_18 = arith.constant 4 : i32
    %50 = vector.broadcast %c4_i32_18 : i32 to vector<8x1xi32>
    %51 = arith.cmpi eq, %32, %50 : vector<8x1xi32>
    %cst_19 = arith.constant 1.000000e-01 : f32
    %cst_20 = arith.constant 1.000000e+00 : f32
    %52 = vector.broadcast %cst_19 : f32 to vector<8x1xf32>
    %53 = vector.broadcast %cst_20 : f32 to vector<8x1xf32>
    %54 = arith.select %51, %52, %53 : vector<8x1xi1>, vector<8x1xf32>
    %55 = arith.mulf %54, %49 : vector<8x1xf32>
    %56 = vector.shape_cast %55 : vector<8x1xf32> to vector<1x8x1xf32>
    %cst_21 = arith.constant dense<0.000000e+00> : vector<1xf32>
    %57 = vector.multi_reduction <add>, %56, %cst_21 [1, 2] : vector<1x8x1xf32> to vector<1xf32>
    %58 = vector.shape_cast %57 : vector<1xf32> to vector<1x1x1xf32>
    %59 = vector.extract %58[0, 0, 0] : f32 from vector<1x1x1xf32>
    %cst_22 = arith.constant 0.000000e+00 : f32
    %60 = arith.addf %cst_22, %59 : f32
    %61 = vector.shape_cast %54 : vector<8x1xf32> to vector<1x8x1xf32>
    %cst_23 = arith.constant dense<0.000000e+00> : vector<1xf32>
    %62 = vector.multi_reduction <add>, %61, %cst_23 [1, 2] : vector<1x8x1xf32> to vector<1xf32>
    %63 = vector.shape_cast %62 : vector<1xf32> to vector<1x1x1xf32>
    %64 = vector.extract %63[0, 0, 0] : f32 from vector<1x1x1xf32>
    %cst_24 = arith.constant 0.000000e+00 : f32
    %65 = arith.addf %cst_24, %64 : f32
    %66 = vector.broadcast %34 : vector<8x1xf32> to vector<8x5xf32>
    %67 = arith.cmpf oeq, %1, %66 : vector<8x5xf32>
    %c5_i32 = arith.constant 5 : i32
    %68 = vector.broadcast %c5_i32 : i32 to vector<8x5xi32>
    %69 = arith.select %67, %42, %68 : vector<8x5xi1>, vector<8x5xi32>
    %cst_25 = arith.constant dense<2147483647> : vector<8xi32>
    %70 = vector.multi_reduction <minsi>, %69, %cst_25 [1] : vector<8x5xi32> to vector<8xi32>
    %71 = vector.shape_cast %70 : vector<8xi32> to vector<8x1xi32>
    %c4_i32_26 = arith.constant 4 : i32
    %72 = vector.broadcast %c4_i32_26 : i32 to vector<8x1xi32>
    %73 = arith.cmpi ne, %71, %72 : vector<8x1xi32>
    %74 = arith.extui %73 : vector<8x1xi1> to vector<8x1xi32>
    %75 = arith.sitofp %74 : vector<8x1xi32> to vector<8x1xf32>
    %76 = vector.shape_cast %75 : vector<8x1xf32> to vector<1x8x1xf32>
    %cst_27 = arith.constant dense<0.000000e+00> : vector<1xf32>
    %77 = vector.multi_reduction <add>, %76, %cst_27 [1, 2] : vector<1x8x1xf32> to vector<1xf32>
    %78 = vector.shape_cast %77 : vector<1xf32> to vector<1x1x1xf32>
    %79 = vector.extract %78[0, 0, 0] : f32 from vector<1x1x1xf32>
    %80 = vector.shape_cast %8 : vector<1x4xf32> to vector<1x1x4xf32>
    %cst_28 = arith.constant dense<0.000000e+00> : vector<1xf32>
    %81 = vector.multi_reduction <add>, %80, %cst_28 [1, 2] : vector<1x1x4xf32> to vector<1xf32>
    %82 = vector.shape_cast %81 : vector<1xf32> to vector<1x1x1xf32>
    %83 = vector.extract %82[0, 0, 0] : f32 from vector<1x1x1xf32>
    %84 = arith.subf %79, %83 : f32
    %85 = math.absf %84 : f32
    %cst_29 = arith.constant 0.000000e+00 : f32
    %86 = arith.addf %cst_29, %85 : f32
    %87 = arith.cmpi eq, %71, %32 : vector<8x1xi32>
    %cst_30 = arith.constant 1.000000e+00 : f32
    %cst_31 = arith.constant 0.000000e+00 : f32
    %88 = vector.broadcast %cst_30 : f32 to vector<8x1xf32>
    %89 = vector.broadcast %cst_31 : f32 to vector<8x1xf32>
    %90 = arith.select %87, %88, %89 : vector<8x1xi1>, vector<8x1xf32>
    %91 = arith.mulf %90, %21 : vector<8x1xf32>
    %92 = vector.shape_cast %91 : vector<8x1xf32> to vector<1x8x1xf32>
    %cst_32 = arith.constant dense<0.000000e+00> : vector<1xf32>
    %93 = vector.multi_reduction <add>, %92, %cst_32 [1, 2] : vector<1x8x1xf32> to vector<1xf32>
    %94 = vector.shape_cast %93 : vector<1xf32> to vector<1x1x1xf32>
    %95 = vector.extract %94[0, 0, 0] : f32 from vector<1x1x1xf32>
    %cst_33 = arith.constant 0.000000e+00 : f32
    %96 = arith.addf %cst_33, %95 : f32
    %cst_34 = arith.constant 0.000000e+00 : f32
    %97 = arith.addf %cst_34, %83 : f32
    %98 = vector.extract_strided_slice %3 {offsets = [0, 0], sizes = [8, 1], strides = [1, 1]} : vector<8x4xf32> to vector<8x1xf32>
    %99 = vector.broadcast %98 : vector<8x1xf32> to vector<8x4xf32>
    %100 = arith.mulf %19, %99 : vector<8x4xf32>
    %cst_35 = arith.constant dense<0.000000e+00> : vector<4xf32>
    %101 = vector.multi_reduction <add>, %100, %cst_35 [0] : vector<8x4xf32> to vector<4xf32>
    %102 = vector.shape_cast %101 : vector<4xf32> to vector<1x4xf32>
    %103 = vector.extract_strided_slice %3 {offsets = [0, 1], sizes = [8, 1], strides = [1, 1]} : vector<8x4xf32> to vector<8x1xf32>
    %104 = vector.broadcast %103 : vector<8x1xf32> to vector<8x4xf32>
    %105 = arith.mulf %19, %104 : vector<8x4xf32>
    %cst_36 = arith.constant dense<0.000000e+00> : vector<4xf32>
    %106 = vector.multi_reduction <add>, %105, %cst_36 [0] : vector<8x4xf32> to vector<4xf32>
    %107 = vector.shape_cast %106 : vector<4xf32> to vector<1x4xf32>
    %108 = vector.extract_strided_slice %3 {offsets = [0, 2], sizes = [8, 1], strides = [1, 1]} : vector<8x4xf32> to vector<8x1xf32>
    %109 = vector.broadcast %108 : vector<8x1xf32> to vector<8x4xf32>
    %110 = arith.mulf %19, %109 : vector<8x4xf32>
    %cst_37 = arith.constant dense<0.000000e+00> : vector<4xf32>
    %111 = vector.multi_reduction <add>, %110, %cst_37 [0] : vector<8x4xf32> to vector<4xf32>
    %112 = vector.shape_cast %111 : vector<4xf32> to vector<1x4xf32>
    %113 = vector.extract_strided_slice %3 {offsets = [0, 3], sizes = [8, 1], strides = [1, 1]} : vector<8x4xf32> to vector<8x1xf32>
    %114 = vector.broadcast %113 : vector<8x1xf32> to vector<8x4xf32>
    %115 = arith.mulf %19, %114 : vector<8x4xf32>
    %cst_38 = arith.constant dense<0.000000e+00> : vector<4xf32>
    %116 = vector.multi_reduction <add>, %115, %cst_38 [0] : vector<8x4xf32> to vector<4xf32>
    %117 = vector.shape_cast %116 : vector<4xf32> to vector<1x4xf32>
    %118 = vector.extract_strided_slice %5 {offsets = [3, 0], sizes = [1, 4], strides = [1, 1]} : vector<7x4xf32> to vector<1x4xf32>
    %119 = vector.extract_strided_slice %5 {offsets = [4, 0], sizes = [1, 4], strides = [1, 1]} : vector<7x4xf32> to vector<1x4xf32>
    %120 = vector.extract_strided_slice %5 {offsets = [5, 0], sizes = [1, 4], strides = [1, 1]} : vector<7x4xf32> to vector<1x4xf32>
    %121 = vector.extract_strided_slice %5 {offsets = [6, 0], sizes = [1, 4], strides = [1, 1]} : vector<7x4xf32> to vector<1x4xf32>
    %122 = arith.subf %102, %118 : vector<1x4xf32>
    %123 = math.absf %122 : vector<1x4xf32>
    %124 = arith.subf %107, %119 : vector<1x4xf32>
    %125 = math.absf %124 : vector<1x4xf32>
    %126 = arith.addf %123, %125 : vector<1x4xf32>
    %127 = arith.subf %112, %120 : vector<1x4xf32>
    %128 = math.absf %127 : vector<1x4xf32>
    %129 = arith.addf %126, %128 : vector<1x4xf32>
    %130 = arith.subf %117, %121 : vector<1x4xf32>
    %131 = math.absf %130 : vector<1x4xf32>
    %132 = arith.addf %129, %131 : vector<1x4xf32>
    %133 = arith.mulf %132, %8 : vector<1x4xf32>
    %134 = vector.shape_cast %133 : vector<1x4xf32> to vector<1x1x4xf32>
    %cst_39 = arith.constant dense<0.000000e+00> : vector<1xf32>
    %135 = vector.multi_reduction <add>, %134, %cst_39 [1, 2] : vector<1x1x4xf32> to vector<1xf32>
    %136 = vector.shape_cast %135 : vector<1xf32> to vector<1x1x1xf32>
    %137 = vector.extract %136[0, 0, 0] : f32 from vector<1x1x1xf32>
    %cst_40 = arith.constant 0.000000e+00 : f32
    %138 = arith.addf %cst_40, %137 : f32
    %cst_41 = arith.constant 5.000000e-01 : f32
    %139 = vector.broadcast %cst_41 : f32 to vector<1x4xf32>
    %140 = arith.mulf %139, %112 : vector<1x4xf32>
    %141 = arith.subf %102, %140 : vector<1x4xf32>
    %cst_42 = arith.constant 5.000000e-01 : f32
    %142 = vector.broadcast %cst_42 : f32 to vector<1x4xf32>
    %143 = arith.mulf %142, %112 : vector<1x4xf32>
    %144 = arith.addf %102, %143 : vector<1x4xf32>
    %cst_43 = arith.constant 5.000000e-01 : f32
    %145 = vector.broadcast %cst_43 : f32 to vector<1x4xf32>
    %146 = arith.mulf %145, %117 : vector<1x4xf32>
    %147 = arith.subf %107, %146 : vector<1x4xf32>
    %cst_44 = arith.constant 5.000000e-01 : f32
    %148 = vector.broadcast %cst_44 : f32 to vector<1x4xf32>
    %149 = arith.mulf %148, %117 : vector<1x4xf32>
    %150 = arith.addf %107, %149 : vector<1x4xf32>
    %cst_45 = arith.constant 5.000000e-01 : f32
    %151 = vector.broadcast %cst_45 : f32 to vector<1x4xf32>
    %152 = arith.mulf %151, %120 : vector<1x4xf32>
    %153 = arith.subf %118, %152 : vector<1x4xf32>
    %cst_46 = arith.constant 5.000000e-01 : f32
    %154 = vector.broadcast %cst_46 : f32 to vector<1x4xf32>
    %155 = arith.mulf %154, %120 : vector<1x4xf32>
    %156 = arith.addf %118, %155 : vector<1x4xf32>
    %cst_47 = arith.constant 5.000000e-01 : f32
    %157 = vector.broadcast %cst_47 : f32 to vector<1x4xf32>
    %158 = arith.mulf %157, %121 : vector<1x4xf32>
    %159 = arith.subf %119, %158 : vector<1x4xf32>
    %cst_48 = arith.constant 5.000000e-01 : f32
    %160 = vector.broadcast %cst_48 : f32 to vector<1x4xf32>
    %161 = arith.mulf %160, %121 : vector<1x4xf32>
    %162 = arith.addf %119, %161 : vector<1x4xf32>
    %163 = arith.subf %144, %141 : vector<1x4xf32>
    %164 = arith.subf %150, %147 : vector<1x4xf32>
    %165 = arith.mulf %163, %164 : vector<1x4xf32>
    %166 = arith.subf %156, %153 : vector<1x4xf32>
    %167 = arith.subf %162, %159 : vector<1x4xf32>
    %168 = arith.mulf %166, %167 : vector<1x4xf32>
    %169 = arith.minimumf %144, %156 : vector<1x4xf32>
    %170 = arith.maximumf %141, %153 : vector<1x4xf32>
    %171 = arith.subf %169, %170 : vector<1x4xf32>
    %cst_49 = arith.constant 0.000000e+00 : f32
    %172 = vector.broadcast %cst_49 : f32 to vector<1x4xf32>
    %173 = arith.maximumf %171, %172 : vector<1x4xf32>
    %174 = arith.minimumf %150, %162 : vector<1x4xf32>
    %175 = arith.maximumf %147, %159 : vector<1x4xf32>
    %176 = arith.subf %174, %175 : vector<1x4xf32>
    %cst_50 = arith.constant 0.000000e+00 : f32
    %177 = vector.broadcast %cst_50 : f32 to vector<1x4xf32>
    %178 = arith.maximumf %176, %177 : vector<1x4xf32>
    %179 = arith.mulf %173, %178 : vector<1x4xf32>
    %180 = arith.addf %165, %168 : vector<1x4xf32>
    %181 = arith.subf %180, %179 : vector<1x4xf32>
    %182 = arith.maximumf %144, %156 : vector<1x4xf32>
    %183 = arith.minimumf %141, %153 : vector<1x4xf32>
    %184 = arith.subf %182, %183 : vector<1x4xf32>
    %cst_51 = arith.constant 0.000000e+00 : f32
    %185 = vector.broadcast %cst_51 : f32 to vector<1x4xf32>
    %186 = arith.maximumf %184, %185 : vector<1x4xf32>
    %187 = arith.maximumf %150, %162 : vector<1x4xf32>
    %188 = arith.minimumf %147, %159 : vector<1x4xf32>
    %189 = arith.subf %187, %188 : vector<1x4xf32>
    %cst_52 = arith.constant 0.000000e+00 : f32
    %190 = vector.broadcast %cst_52 : f32 to vector<1x4xf32>
    %191 = arith.maximumf %189, %190 : vector<1x4xf32>
    %192 = arith.mulf %186, %191 : vector<1x4xf32>
    %cst_53 = arith.constant 5.000000e-01 : f32
    %193 = vector.broadcast %cst_53 : f32 to vector<1x4xf32>
    %194 = arith.cmpf ogt, %8, %193 : vector<1x4xf32>
    %cst_54 = arith.constant 1.000000e+00 : f32
    %195 = vector.broadcast %cst_54 : f32 to vector<1x4xf32>
    %196 = arith.select %194, %181, %195 : vector<1x4xi1>, vector<1x4xf32>
    %cst_55 = arith.constant 5.000000e-01 : f32
    %197 = vector.broadcast %cst_55 : f32 to vector<1x4xf32>
    %198 = arith.cmpf ogt, %8, %197 : vector<1x4xf32>
    %cst_56 = arith.constant 1.000000e+00 : f32
    %199 = vector.broadcast %cst_56 : f32 to vector<1x4xf32>
    %200 = arith.select %198, %192, %199 : vector<1x4xi1>, vector<1x4xf32>
    %201 = arith.divf %179, %196 : vector<1x4xf32>
    %202 = arith.subf %192, %181 : vector<1x4xf32>
    %203 = arith.divf %202, %200 : vector<1x4xf32>
    %204 = arith.subf %201, %203 : vector<1x4xf32>
    %cst_57 = arith.constant 1.000000e+00 : f32
    %205 = vector.broadcast %cst_57 : f32 to vector<1x4xf32>
    %206 = arith.subf %205, %204 : vector<1x4xf32>
    %207 = arith.mulf %206, %8 : vector<1x4xf32>
    %208 = vector.shape_cast %207 : vector<1x4xf32> to vector<1x1x4xf32>
    %cst_58 = arith.constant dense<0.000000e+00> : vector<1xf32>
    %209 = vector.multi_reduction <add>, %208, %cst_58 [1, 2] : vector<1x1x4xf32> to vector<1xf32>
    %210 = vector.shape_cast %209 : vector<1xf32> to vector<1x1x1xf32>
    %211 = vector.extract %210[0, 0, 0] : f32 from vector<1x1x1xf32>
    %cst_59 = arith.constant 0.000000e+00 : f32
    %212 = arith.addf %cst_59, %211 : f32
    %c1 = arith.constant 1 : index
    %c0_60 = arith.constant 0 : index
    %c0_61 = arith.constant 0 : index
    %213 = vector.load %arg0[%c1, %c0_60, %c0_61] : memref<2x8x5xf32, #tpu.memory_space<vmem>>, vector<1x8x5xf32>
    %214 = vector.shape_cast %213 : vector<1x8x5xf32> to vector<8x5xf32>
    %c1_62 = arith.constant 1 : index
    %c0_63 = arith.constant 0 : index
    %c0_64 = arith.constant 0 : index
    %215 = vector.load %arg1[%c1_62, %c0_63, %c0_64] : memref<2x8x4xf32, #tpu.memory_space<vmem>>, vector<1x8x4xf32>
    %216 = vector.shape_cast %215 : vector<1x8x4xf32> to vector<8x4xf32>
    %c1_65 = arith.constant 1 : index
    %c0_66 = arith.constant 0 : index
    %c0_67 = arith.constant 0 : index
    %217 = vector.load %arg2[%c1_65, %c0_66, %c0_67] : memref<2x7x4xf32, #tpu.memory_space<vmem>>, vector<1x7x4xf32>
    %218 = vector.shape_cast %217 : vector<1x7x4xf32> to vector<7x4xf32>
    %219 = vector.extract_strided_slice %218 {offsets = [0, 0], sizes = [1, 4], strides = [1, 1]} : vector<7x4xf32> to vector<1x4xf32>
    %220 = vector.extract_strided_slice %218 {offsets = [1, 0], sizes = [1, 4], strides = [1, 1]} : vector<7x4xf32> to vector<1x4xf32>
    %221 = vector.extract_strided_slice %218 {offsets = [2, 0], sizes = [1, 4], strides = [1, 1]} : vector<7x4xf32> to vector<1x4xf32>
    %222 = tpu.iota {dimensions = array<i32: 0>} : vector<8x4xi32>
    %223 = arith.fptosi %219 : vector<1x4xf32> to vector<1x4xi32>
    %224 = vector.broadcast %223 : vector<1x4xi32> to vector<8x4xi32>
    %225 = arith.cmpi eq, %222, %224 : vector<8x4xi32>
    %cst_68 = arith.constant 5.000000e-01 : f32
    %226 = vector.broadcast %cst_68 : f32 to vector<1x4xf32>
    %227 = arith.cmpf ogt, %221, %226 : vector<1x4xf32>
    %228 = vector.broadcast %227 : vector<1x4xi1> to vector<8x4xi1>
    %229 = arith.andi %225, %228 : vector<8x4xi1>
    %cst_69 = arith.constant 1.000000e+00 : f32
    %cst_70 = arith.constant 0.000000e+00 : f32
    %230 = vector.broadcast %cst_69 : f32 to vector<8x4xf32>
    %231 = vector.broadcast %cst_70 : f32 to vector<8x4xf32>
    %232 = arith.select %229, %230, %231 : vector<8x4xi1>, vector<8x4xf32>
    %cst_71 = arith.constant dense<0.000000e+00> : vector<8xf32>
    %233 = vector.multi_reduction <add>, %232, %cst_71 [1] : vector<8x4xf32> to vector<8xf32>
    %234 = vector.shape_cast %233 : vector<8xf32> to vector<8x1xf32>
    %235 = vector.broadcast %220 : vector<1x4xf32> to vector<8x4xf32>
    %236 = arith.mulf %232, %235 : vector<8x4xf32>
    %cst_72 = arith.constant dense<0.000000e+00> : vector<8xf32>
    %237 = vector.multi_reduction <add>, %236, %cst_72 [1] : vector<8x4xf32> to vector<8xf32>
    %238 = vector.shape_cast %237 : vector<8xf32> to vector<8x1xf32>
    %cst_73 = arith.constant 5.000000e-01 : f32
    %239 = vector.broadcast %cst_73 : f32 to vector<8x1xf32>
    %240 = arith.cmpf ogt, %234, %239 : vector<8x1xf32>
    %cst_74 = arith.constant 5.000000e-01 : f32
    %241 = vector.broadcast %cst_74 : f32 to vector<8x1xf32>
    %242 = arith.addf %238, %241 : vector<8x1xf32>
    %243 = arith.fptosi %242 : vector<8x1xf32> to vector<8x1xi32>
    %c4_i32_75 = arith.constant 4 : i32
    %244 = vector.broadcast %c4_i32_75 : i32 to vector<8x1xi32>
    %245 = arith.select %240, %243, %244 : vector<8x1xi1>, vector<8x1xi32>
    %cst_76 = arith.constant dense<0xFF800000> : vector<8xf32>
    %246 = vector.multi_reduction <maximumf>, %214, %cst_76 [1] : vector<8x5xf32> to vector<8xf32>
    %247 = vector.shape_cast %246 : vector<8xf32> to vector<8x1xf32>
    %248 = vector.broadcast %247 : vector<8x1xf32> to vector<8x5xf32>
    %249 = arith.subf %214, %248 : vector<8x5xf32>
    %250 = math.exp %249 : vector<8x5xf32>
    %cst_77 = arith.constant dense<0.000000e+00> : vector<8xf32>
    %251 = vector.multi_reduction <add>, %250, %cst_77 [1] : vector<8x5xf32> to vector<8xf32>
    %252 = vector.shape_cast %251 : vector<8xf32> to vector<8x1xf32>
    %253 = math.log %252 : vector<8x1xf32>
    %254 = arith.addf %247, %253 : vector<8x1xf32>
    %255 = tpu.iota {dimensions = array<i32: 1>} : vector<8x5xi32>
    %256 = vector.broadcast %245 : vector<8x1xi32> to vector<8x5xi32>
    %257 = arith.cmpi eq, %255, %256 : vector<8x5xi32>
    %cst_78 = arith.constant 0.000000e+00 : f32
    %258 = vector.broadcast %cst_78 : f32 to vector<8x5xf32>
    %259 = arith.select %257, %214, %258 : vector<8x5xi1>, vector<8x5xf32>
    %cst_79 = arith.constant dense<0.000000e+00> : vector<8xf32>
    %260 = vector.multi_reduction <add>, %259, %cst_79 [1] : vector<8x5xf32> to vector<8xf32>
    %261 = vector.shape_cast %260 : vector<8xf32> to vector<8x1xf32>
    %262 = arith.subf %254, %261 : vector<8x1xf32>
    %c4_i32_80 = arith.constant 4 : i32
    %263 = vector.broadcast %c4_i32_80 : i32 to vector<8x1xi32>
    %264 = arith.cmpi eq, %245, %263 : vector<8x1xi32>
    %cst_81 = arith.constant 1.000000e-01 : f32
    %cst_82 = arith.constant 1.000000e+00 : f32
    %265 = vector.broadcast %cst_81 : f32 to vector<8x1xf32>
    %266 = vector.broadcast %cst_82 : f32 to vector<8x1xf32>
    %267 = arith.select %264, %265, %266 : vector<8x1xi1>, vector<8x1xf32>
    %268 = arith.mulf %267, %262 : vector<8x1xf32>
    %269 = vector.shape_cast %268 : vector<8x1xf32> to vector<1x8x1xf32>
    %cst_83 = arith.constant dense<0.000000e+00> : vector<1xf32>
    %270 = vector.multi_reduction <add>, %269, %cst_83 [1, 2] : vector<1x8x1xf32> to vector<1xf32>
    %271 = vector.shape_cast %270 : vector<1xf32> to vector<1x1x1xf32>
    %272 = vector.extract %271[0, 0, 0] : f32 from vector<1x1x1xf32>
    %273 = arith.addf %60, %272 : f32
    %274 = vector.shape_cast %267 : vector<8x1xf32> to vector<1x8x1xf32>
    %cst_84 = arith.constant dense<0.000000e+00> : vector<1xf32>
    %275 = vector.multi_reduction <add>, %274, %cst_84 [1, 2] : vector<1x8x1xf32> to vector<1xf32>
    %276 = vector.shape_cast %275 : vector<1xf32> to vector<1x1x1xf32>
    %277 = vector.extract %276[0, 0, 0] : f32 from vector<1x1x1xf32>
    %278 = arith.addf %65, %277 : f32
    %279 = vector.broadcast %247 : vector<8x1xf32> to vector<8x5xf32>
    %280 = arith.cmpf oeq, %214, %279 : vector<8x5xf32>
    %c5_i32_85 = arith.constant 5 : i32
    %281 = vector.broadcast %c5_i32_85 : i32 to vector<8x5xi32>
    %282 = arith.select %280, %255, %281 : vector<8x5xi1>, vector<8x5xi32>
    %cst_86 = arith.constant dense<2147483647> : vector<8xi32>
    %283 = vector.multi_reduction <minsi>, %282, %cst_86 [1] : vector<8x5xi32> to vector<8xi32>
    %284 = vector.shape_cast %283 : vector<8xi32> to vector<8x1xi32>
    %c4_i32_87 = arith.constant 4 : i32
    %285 = vector.broadcast %c4_i32_87 : i32 to vector<8x1xi32>
    %286 = arith.cmpi ne, %284, %285 : vector<8x1xi32>
    %287 = arith.extui %286 : vector<8x1xi1> to vector<8x1xi32>
    %288 = arith.sitofp %287 : vector<8x1xi32> to vector<8x1xf32>
    %289 = vector.shape_cast %288 : vector<8x1xf32> to vector<1x8x1xf32>
    %cst_88 = arith.constant dense<0.000000e+00> : vector<1xf32>
    %290 = vector.multi_reduction <add>, %289, %cst_88 [1, 2] : vector<1x8x1xf32> to vector<1xf32>
    %291 = vector.shape_cast %290 : vector<1xf32> to vector<1x1x1xf32>
    %292 = vector.extract %291[0, 0, 0] : f32 from vector<1x1x1xf32>
    %293 = vector.shape_cast %221 : vector<1x4xf32> to vector<1x1x4xf32>
    %cst_89 = arith.constant dense<0.000000e+00> : vector<1xf32>
    %294 = vector.multi_reduction <add>, %293, %cst_89 [1, 2] : vector<1x1x4xf32> to vector<1xf32>
    %295 = vector.shape_cast %294 : vector<1xf32> to vector<1x1x1xf32>
    %296 = vector.extract %295[0, 0, 0] : f32 from vector<1x1x1xf32>
    %297 = arith.subf %292, %296 : f32
    %298 = math.absf %297 : f32
    %299 = arith.addf %86, %298 : f32
    %300 = arith.cmpi eq, %284, %245 : vector<8x1xi32>
    %cst_90 = arith.constant 1.000000e+00 : f32
    %cst_91 = arith.constant 0.000000e+00 : f32
    %301 = vector.broadcast %cst_90 : f32 to vector<8x1xf32>
    %302 = vector.broadcast %cst_91 : f32 to vector<8x1xf32>
    %303 = arith.select %300, %301, %302 : vector<8x1xi1>, vector<8x1xf32>
    %304 = arith.mulf %303, %234 : vector<8x1xf32>
    %305 = vector.shape_cast %304 : vector<8x1xf32> to vector<1x8x1xf32>
    %cst_92 = arith.constant dense<0.000000e+00> : vector<1xf32>
    %306 = vector.multi_reduction <add>, %305, %cst_92 [1, 2] : vector<1x8x1xf32> to vector<1xf32>
    %307 = vector.shape_cast %306 : vector<1xf32> to vector<1x1x1xf32>
    %308 = vector.extract %307[0, 0, 0] : f32 from vector<1x1x1xf32>
    %309 = arith.addf %96, %308 : f32
    %310 = arith.addf %97, %296 : f32
    %311 = vector.extract_strided_slice %216 {offsets = [0, 0], sizes = [8, 1], strides = [1, 1]} : vector<8x4xf32> to vector<8x1xf32>
    %312 = vector.broadcast %311 : vector<8x1xf32> to vector<8x4xf32>
    %313 = arith.mulf %232, %312 : vector<8x4xf32>
    %cst_93 = arith.constant dense<0.000000e+00> : vector<4xf32>
    %314 = vector.multi_reduction <add>, %313, %cst_93 [0] : vector<8x4xf32> to vector<4xf32>
    %315 = vector.shape_cast %314 : vector<4xf32> to vector<1x4xf32>
    %316 = vector.extract_strided_slice %216 {offsets = [0, 1], sizes = [8, 1], strides = [1, 1]} : vector<8x4xf32> to vector<8x1xf32>
    %317 = vector.broadcast %316 : vector<8x1xf32> to vector<8x4xf32>
    %318 = arith.mulf %232, %317 : vector<8x4xf32>
    %cst_94 = arith.constant dense<0.000000e+00> : vector<4xf32>
    %319 = vector.multi_reduction <add>, %318, %cst_94 [0] : vector<8x4xf32> to vector<4xf32>
    %320 = vector.shape_cast %319 : vector<4xf32> to vector<1x4xf32>
    %321 = vector.extract_strided_slice %216 {offsets = [0, 2], sizes = [8, 1], strides = [1, 1]} : vector<8x4xf32> to vector<8x1xf32>
    %322 = vector.broadcast %321 : vector<8x1xf32> to vector<8x4xf32>
    %323 = arith.mulf %232, %322 : vector<8x4xf32>
    %cst_95 = arith.constant dense<0.000000e+00> : vector<4xf32>
    %324 = vector.multi_reduction <add>, %323, %cst_95 [0] : vector<8x4xf32> to vector<4xf32>
    %325 = vector.shape_cast %324 : vector<4xf32> to vector<1x4xf32>
    %326 = vector.extract_strided_slice %216 {offsets = [0, 3], sizes = [8, 1], strides = [1, 1]} : vector<8x4xf32> to vector<8x1xf32>
    %327 = vector.broadcast %326 : vector<8x1xf32> to vector<8x4xf32>
    %328 = arith.mulf %232, %327 : vector<8x4xf32>
    %cst_96 = arith.constant dense<0.000000e+00> : vector<4xf32>
    %329 = vector.multi_reduction <add>, %328, %cst_96 [0] : vector<8x4xf32> to vector<4xf32>
    %330 = vector.shape_cast %329 : vector<4xf32> to vector<1x4xf32>
    %331 = vector.extract_strided_slice %218 {offsets = [3, 0], sizes = [1, 4], strides = [1, 1]} : vector<7x4xf32> to vector<1x4xf32>
    %332 = vector.extract_strided_slice %218 {offsets = [4, 0], sizes = [1, 4], strides = [1, 1]} : vector<7x4xf32> to vector<1x4xf32>
    %333 = vector.extract_strided_slice %218 {offsets = [5, 0], sizes = [1, 4], strides = [1, 1]} : vector<7x4xf32> to vector<1x4xf32>
    %334 = vector.extract_strided_slice %218 {offsets = [6, 0], sizes = [1, 4], strides = [1, 1]} : vector<7x4xf32> to vector<1x4xf32>
    %335 = arith.subf %315, %331 : vector<1x4xf32>
    %336 = math.absf %335 : vector<1x4xf32>
    %337 = arith.subf %320, %332 : vector<1x4xf32>
    %338 = math.absf %337 : vector<1x4xf32>
    %339 = arith.addf %336, %338 : vector<1x4xf32>
    %340 = arith.subf %325, %333 : vector<1x4xf32>
    %341 = math.absf %340 : vector<1x4xf32>
    %342 = arith.addf %339, %341 : vector<1x4xf32>
    %343 = arith.subf %330, %334 : vector<1x4xf32>
    %344 = math.absf %343 : vector<1x4xf32>
    %345 = arith.addf %342, %344 : vector<1x4xf32>
    %346 = arith.mulf %345, %221 : vector<1x4xf32>
    %347 = vector.shape_cast %346 : vector<1x4xf32> to vector<1x1x4xf32>
    %cst_97 = arith.constant dense<0.000000e+00> : vector<1xf32>
    %348 = vector.multi_reduction <add>, %347, %cst_97 [1, 2] : vector<1x1x4xf32> to vector<1xf32>
    %349 = vector.shape_cast %348 : vector<1xf32> to vector<1x1x1xf32>
    %350 = vector.extract %349[0, 0, 0] : f32 from vector<1x1x1xf32>
    %351 = arith.addf %138, %350 : f32
    %cst_98 = arith.constant 5.000000e-01 : f32
    %352 = vector.broadcast %cst_98 : f32 to vector<1x4xf32>
    %353 = arith.mulf %352, %325 : vector<1x4xf32>
    %354 = arith.subf %315, %353 : vector<1x4xf32>
    %cst_99 = arith.constant 5.000000e-01 : f32
    %355 = vector.broadcast %cst_99 : f32 to vector<1x4xf32>
    %356 = arith.mulf %355, %325 : vector<1x4xf32>
    %357 = arith.addf %315, %356 : vector<1x4xf32>
    %cst_100 = arith.constant 5.000000e-01 : f32
    %358 = vector.broadcast %cst_100 : f32 to vector<1x4xf32>
    %359 = arith.mulf %358, %330 : vector<1x4xf32>
    %360 = arith.subf %320, %359 : vector<1x4xf32>
    %cst_101 = arith.constant 5.000000e-01 : f32
    %361 = vector.broadcast %cst_101 : f32 to vector<1x4xf32>
    %362 = arith.mulf %361, %330 : vector<1x4xf32>
    %363 = arith.addf %320, %362 : vector<1x4xf32>
    %cst_102 = arith.constant 5.000000e-01 : f32
    %364 = vector.broadcast %cst_102 : f32 to vector<1x4xf32>
    %365 = arith.mulf %364, %333 : vector<1x4xf32>
    %366 = arith.subf %331, %365 : vector<1x4xf32>
    %cst_103 = arith.constant 5.000000e-01 : f32
    %367 = vector.broadcast %cst_103 : f32 to vector<1x4xf32>
    %368 = arith.mulf %367, %333 : vector<1x4xf32>
    %369 = arith.addf %331, %368 : vector<1x4xf32>
    %cst_104 = arith.constant 5.000000e-01 : f32
    %370 = vector.broadcast %cst_104 : f32 to vector<1x4xf32>
    %371 = arith.mulf %370, %334 : vector<1x4xf32>
    %372 = arith.subf %332, %371 : vector<1x4xf32>
    %cst_105 = arith.constant 5.000000e-01 : f32
    %373 = vector.broadcast %cst_105 : f32 to vector<1x4xf32>
    %374 = arith.mulf %373, %334 : vector<1x4xf32>
    %375 = arith.addf %332, %374 : vector<1x4xf32>
    %376 = arith.subf %357, %354 : vector<1x4xf32>
    %377 = arith.subf %363, %360 : vector<1x4xf32>
    %378 = arith.mulf %376, %377 : vector<1x4xf32>
    %379 = arith.subf %369, %366 : vector<1x4xf32>
    %380 = arith.subf %375, %372 : vector<1x4xf32>
    %381 = arith.mulf %379, %380 : vector<1x4xf32>
    %382 = arith.minimumf %357, %369 : vector<1x4xf32>
    %383 = arith.maximumf %354, %366 : vector<1x4xf32>
    %384 = arith.subf %382, %383 : vector<1x4xf32>
    %cst_106 = arith.constant 0.000000e+00 : f32
    %385 = vector.broadcast %cst_106 : f32 to vector<1x4xf32>
    %386 = arith.maximumf %384, %385 : vector<1x4xf32>
    %387 = arith.minimumf %363, %375 : vector<1x4xf32>
    %388 = arith.maximumf %360, %372 : vector<1x4xf32>
    %389 = arith.subf %387, %388 : vector<1x4xf32>
    %cst_107 = arith.constant 0.000000e+00 : f32
    %390 = vector.broadcast %cst_107 : f32 to vector<1x4xf32>
    %391 = arith.maximumf %389, %390 : vector<1x4xf32>
    %392 = arith.mulf %386, %391 : vector<1x4xf32>
    %393 = arith.addf %378, %381 : vector<1x4xf32>
    %394 = arith.subf %393, %392 : vector<1x4xf32>
    %395 = arith.maximumf %357, %369 : vector<1x4xf32>
    %396 = arith.minimumf %354, %366 : vector<1x4xf32>
    %397 = arith.subf %395, %396 : vector<1x4xf32>
    %cst_108 = arith.constant 0.000000e+00 : f32
    %398 = vector.broadcast %cst_108 : f32 to vector<1x4xf32>
    %399 = arith.maximumf %397, %398 : vector<1x4xf32>
    %400 = arith.maximumf %363, %375 : vector<1x4xf32>
    %401 = arith.minimumf %360, %372 : vector<1x4xf32>
    %402 = arith.subf %400, %401 : vector<1x4xf32>
    %cst_109 = arith.constant 0.000000e+00 : f32
    %403 = vector.broadcast %cst_109 : f32 to vector<1x4xf32>
    %404 = arith.maximumf %402, %403 : vector<1x4xf32>
    %405 = arith.mulf %399, %404 : vector<1x4xf32>
    %cst_110 = arith.constant 5.000000e-01 : f32
    %406 = vector.broadcast %cst_110 : f32 to vector<1x4xf32>
    %407 = arith.cmpf ogt, %221, %406 : vector<1x4xf32>
    %cst_111 = arith.constant 1.000000e+00 : f32
    %408 = vector.broadcast %cst_111 : f32 to vector<1x4xf32>
    %409 = arith.select %407, %394, %408 : vector<1x4xi1>, vector<1x4xf32>
    %cst_112 = arith.constant 5.000000e-01 : f32
    %410 = vector.broadcast %cst_112 : f32 to vector<1x4xf32>
    %411 = arith.cmpf ogt, %221, %410 : vector<1x4xf32>
    %cst_113 = arith.constant 1.000000e+00 : f32
    %412 = vector.broadcast %cst_113 : f32 to vector<1x4xf32>
    %413 = arith.select %411, %405, %412 : vector<1x4xi1>, vector<1x4xf32>
    %414 = arith.divf %392, %409 : vector<1x4xf32>
    %415 = arith.subf %405, %394 : vector<1x4xf32>
    %416 = arith.divf %415, %413 : vector<1x4xf32>
    %417 = arith.subf %414, %416 : vector<1x4xf32>
    %cst_114 = arith.constant 1.000000e+00 : f32
    %418 = vector.broadcast %cst_114 : f32 to vector<1x4xf32>
    %419 = arith.subf %418, %417 : vector<1x4xf32>
    %420 = arith.mulf %419, %221 : vector<1x4xf32>
    %421 = vector.shape_cast %420 : vector<1x4xf32> to vector<1x1x4xf32>
    %cst_115 = arith.constant dense<0.000000e+00> : vector<1xf32>
    %422 = vector.multi_reduction <add>, %421, %cst_115 [1, 2] : vector<1x1x4xf32> to vector<1xf32>
    %423 = vector.shape_cast %422 : vector<1xf32> to vector<1x1x1xf32>
    %424 = vector.extract %423[0, 0, 0] : f32 from vector<1x1x1xf32>
    %425 = arith.addf %212, %424 : f32
    %cst_116 = arith.constant 1.000000e+00 : f32
    %426 = arith.maximumf %310, %cst_116 : f32
    %427 = arith.divf %273, %278 : f32
    %c0_117 = arith.constant 0 : index
    %428 = memref.load %arg3[%c0_117] : memref<8xf32, #tpu.memory_space<smem>>
    memref.store %427, %arg3[%c0_117] : memref<8xf32, #tpu.memory_space<smem>>
    %cst_118 = arith.constant 1.000000e+02 : f32
    %429 = arith.mulf %cst_118, %309 : f32
    %430 = arith.divf %429, %426 : f32
    %cst_119 = arith.constant 1.000000e+02 : f32
    %431 = arith.subf %cst_119, %430 : f32
    %c1_120 = arith.constant 1 : index
    %432 = memref.load %arg3[%c1_120] : memref<8xf32, #tpu.memory_space<smem>>
    memref.store %431, %arg3[%c1_120] : memref<8xf32, #tpu.memory_space<smem>>
    %cst_121 = arith.constant 2.000000e+00 : f32
    %433 = arith.divf %299, %cst_121 : f32
    %c2 = arith.constant 2 : index
    %434 = memref.load %arg3[%c2] : memref<8xf32, #tpu.memory_space<smem>>
    memref.store %433, %arg3[%c2] : memref<8xf32, #tpu.memory_space<smem>>
    %435 = arith.divf %351, %426 : f32
    %c3 = arith.constant 3 : index
    %436 = memref.load %arg3[%c3] : memref<8xf32, #tpu.memory_space<smem>>
    memref.store %435, %arg3[%c3] : memref<8xf32, #tpu.memory_space<smem>>
    %437 = arith.divf %425, %426 : f32
    %c4 = arith.constant 4 : index
    %438 = memref.load %arg3[%c4] : memref<8xf32, #tpu.memory_space<smem>>
    memref.store %437, %arg3[%c4] : memref<8xf32, #tpu.memory_space<smem>>
    %cst_122 = arith.constant 0.000000e+00 : f32
    %c5 = arith.constant 5 : index
    %439 = memref.load %arg3[%c5] : memref<8xf32, #tpu.memory_space<smem>>
    memref.store %cst_122, %arg3[%c5] : memref<8xf32, #tpu.memory_space<smem>>
    %cst_123 = arith.constant 0.000000e+00 : f32
    %c6 = arith.constant 6 : index
    %440 = memref.load %arg3[%c6] : memref<8xf32, #tpu.memory_space<smem>>
    memref.store %cst_123, %arg3[%c6] : memref<8xf32, #tpu.memory_space<smem>>
    %cst_124 = arith.constant 0.000000e+00 : f32
    %c7 = arith.constant 7 : index
    %441 = memref.load %arg3[%c7] : memref<8xf32, #tpu.memory_space<smem>>
    memref.store %cst_124, %arg3[%c7] : memref<8xf32, #tpu.memory_space<smem>>
    return
  }
}

</mosaic_0001>

<bundles_post_ra>
// kernel: _forward_impl.1
= control target key start
LH: loop header
LB: loop body
LE: loop exit
PB: predicated region body
PF: predicated region fallthrough
CT: control target
= control target key end

     0   :  { %vm42_vm0 = vcmask 39936   ;;  %v894_v2 = vmov 1   ;;  %v18_v5 = vlaneseq  ;;  %s1192_s0 = inlined_call_operand.vmem [shape: f32[2,8,5], index: 0, kind: input, shape index: {}]   ;;  %s1193_s1 = inlined_call_operand.vmem [shape: f32[2,8,4], index: 1, kind: input, shape index: {}]   ;;  %s1194_s2 = inlined_call_operand.vmem [shape: f32[2,7,4], index: 2, kind: input, shape index: {}]   ;;  %s1195_s3 = inlined_call_operand.vmem [shape: f32[8], index: 3, kind: output, shape index: {}]  }
   0x1   :  { %v927_v0 = vld [vmem:[%s1193_s1] sm:$0xff]  ;;  %850 = vset.pattern.permute.xlu1 %v894_v2  ;;  %854 = vset.pattern.permute.xlu0 %v894_v2 }
   0x2   :  { %v932_v1 = vld [vmem:[%s1192_s0] sm:$0xff]  ;;  %165 = vperm.xlu1 %850, %v927_v0  }
   0x3   :  { %v43_v3 = vsel %vm42_vm0, %v932_v1, -inf  ;;  %v939_v4 = vld [vmem:[%s1194_s2] sm:$0x7f] }
   0x4   :  { %44 = vmax.xlane.f32.xlu0 %v43_v3  ;;  %vm786_vm1 = vcmp.lt.s32.totalorder %v939_v4, 0  ;;  %v787_v6 = vceil.f32 %v939_v4  ;;  %v788_v7 = vfloor.f32 %v939_v4 }
   0x5   :  { %8 = vsyncpa [#allocation3], 0  ;;  %vm23_vm2 = vcmp.gt.f32.partialorder %v939_v4, 0.5  ;;  %v949_v8 = vld [vmem:[%s1192_s0 + $0x8] sm:$0xff]  ;;  %v895_v10 = vmov 0   ;;  %v19_v12 = vshrl.u32 %v18_v5, 7 }
   0x6   :  { %v789_v9 = vsel %vm786_vm1, %v787_v6, %v788_v7  ;;  %v24_v11 = vsel %vm23_vm2, 1, %v895_v10  ;;  %v957_v15 = vld [vmem:[%s1194_s2 + $0x8] sm:$0x7f]  ;;  %v372_v16 = vsel %vm42_vm0, %v949_v8, -inf  ;;  %v33_v18 = vperm.slane %v939_v4, 1  ;;  %s902_s13 = smov 1.0  }
   0x7   :  { %v790_v13 = vcvt.f32.s32 %v789_v9  ;;  %v25_v14 = vperm.slane %v24_v11, 2  ;;  %v811_v19 = vceil.f32 %v957_v15  ;;  %v812_v20 = vfloor.f32 %v957_v15  ;;  %v1018_v59 = vld [vmem:[%s1193_s1 + $0x8] sm:$0xff]  ;;  %s900_s1 = smov 0.0   ;;  %s771_s20 = sshll.u32 %s1195_s3, 4  ;;  %s772_s20 = int_to_ptr.vmem [resolvable:$true] %s771_s20 }
   0x8   :  { %vm810_vm6 = vcmp.lt.s32.totalorder %v957_v15, 0  ;;  %v896_v21 = vmov 0.0   ;;  %vm29_vm7 = vcmask 31744   ;;  %v897_v25 = vmov 2   ;;  %761 = sst [smem:[#allocation2 + $0x5]] %s900_s1 }
   0x9   :  { %v21_v17 = vperm.slane %v790_v13, 0  ;;  %vm26_vm3 = vcmp.eq.s32.totalorder %v25_v14, 1  ;;  %v813_v24 = vsel %vm810_vm6, %v811_v19, %v812_v20  ;;  %851 = vset.pattern.permute.xlu2 %v897_v25  ;;  %v898_v26 = vmov 3   ;;  %763 = sst [smem:[#allocation2 + $0x6]] %s900_s1 }
   0xa   :  { %853 = vset.pattern.permute.xlu1 %v898_v26  ;;  %vm354_vm8 = vcmp.gt.f32.partialorder %v957_v15, 0.5  ;;  %177 = vperm.xlu2 %851, %v927_v0   ;;  %v814_v28 = vcvt.f32.s32 %v813_v24  ;;  %v363_v35 = vperm.slane %v957_v15, 1  ;;  %v56_v38 = vand.u32 127, %v18_v5  ;;  %765 = sst [smem:[#allocation2 + $0x7]] %s900_s1 }
   0xb   :  { %vm22_vm4 = vcmp.eq.s32.totalorder %v19_v12, %v21_v17  ;;  %v355_v29 = vsel %vm354_vm8, 1, %v895_v10 }
   0xc   :  { %373 = vmax.xlane.f32.xlu0 %v372_v16  ;;  %vm27_vm5 = vmand %vm22_vm4, %vm26_vm3  ;;  %v352_v30 = vperm.slane %v814_v28, 0  ;;  %v356_v31 = vperm.slane %v355_v29, 2 }
   0xd   :  { %v966_v22 = vsel %vm27_vm5, 1.0, %v896_v21 }
   0xe   :  { %v34_v23 = vmul.f32 %v33_v18, %v966_v22  ;;  %v30_v32 = vsel %vm29_vm7, %v966_v22, 0.0  ;;  %vm353_vm9 = vcmp.eq.s32.totalorder %v19_v12, %v352_v30  ;;  %vm357_vm10 = vcmp.eq.s32.totalorder %v356_v31, 1 }
   0xf   :  { %vm358_vm11 = vmand %vm353_vm9, %vm357_vm10 }
  0x10   :  { %v35_v27 = vsel %vm29_vm7, %v34_v23, 0.0  ;;  %v981_v33 = vsel %vm358_vm11, 1.0, %v896_v21 }
  0x11   :  { %v360_v34 = vsel %vm29_vm7, %v981_v33, 0.0  ;;  %v364_v36 = vmul.f32 %v363_v35, %v981_v33 }
  0x12   :  { %852 = vset.pattern.permute.xlu2 %v895_v10 }
  0x13   :  { %153 = vperm.xlu2 %852, %v927_v0   ;;  %v365_v37 = vsel %vm29_vm7, %v364_v36, 0.0 }
  0x14   :  { %36 = vadd.xlane.f32.xlu0 %v35_v27 }
  0x1b   :  { %855 = vset.pattern.permute.xlu2 %v897_v25 }
  0x1c   :  { %31 = vadd.xlane.f32.xlu0 %v30_v32 }
  0x24   :  { %361 = vadd.xlane.f32.xlu0 %v360_v34 }
  0x2c   :  { %366 = vadd.xlane.f32.xlu1 %v365_v37 }
  0x45   :  { %189 = vperm.xlu1 %853, %v927_v0  }
  0x4d   :  { %514 = vperm.xlu1 %853, %v1018_v59  }
  0x55   :  { %856 = vset.pattern.permute.xlu1 %v895_v10 }
  0x64   :  { %v178_v19 = vpop.permute.xlu2 %177 }
  0x65   :  { %v180_v24 = vmul.f32 %v178_v19, %v966_v22 }
  0x6d   :  { %v154_v28 = vpop.permute.xlu2 %153 }
  0x6e   :  { %v156_v30 = vmul.f32 %v154_v28, %v966_v22 }
  0x70   :  { %v157_v34 = vsel %vm29_vm7, %v156_v30, 0.0 }
  0x74   :  { %v166_v3 = vpop.permute.xlu1 %165 }
  0x75   :  { %v168_v25 = vmul.f32 %v166_v3, %v966_v22 }
  0x77   :  { %v989_v39 = vpop.xlane.xlu0 %44  ;;  %v169_v29 = vsel %vm29_vm7, %v168_v25, 0.0 }
  0x78   :  { %vm89_vm12 = vcmp.eq.f32.partialorder %v932_v1, %v989_v39  ;;  %v46_v43 = vsub.f32 %v932_v1, %v989_v39  ;;  %v170_v32 = vrot.slane %v169_v29, 4 }
  0x79   :  { %v90_v40 = vsel %vm89_vm12, %v56_v38, 5 }
  0x7a   :  { %v994_v41 = vsel %vm42_vm0, %v90_v40, 2147483647  ;;  %v47_v46 = vmul.f32 1.442695, %v46_v43  ;;  %v171_v37 = vadd.f32 %v170_v32, %v169_v29 }
  0x7b   :  { %v93_v42 = vshra.s32 %v994_v41, 16 }
  0x7c   :  { %858 = vpow2.f32 %v47_v46  ;;  %v172_v43 = vrot.slane %v171_v37, 2 }
  0x7d   :  { %v999_v44 = vcvt.s32.f32 %v93_v42 }
  0x7f   :  { %96 = vmin.xlane.f32.xlu2 %v999_v44  ;;  %v1002_v45 = vpop.xlane.xlu0 %373 }
  0x80   :  { %vm415_vm13 = vcmp.eq.f32.partialorder %v949_v8, %v1002_v45  ;;  %v375_v50 = vsub.f32 %v949_v8, %v1002_v45 }
  0x81   :  { %v416_v47 = vsel %vm415_vm13, %v56_v38, 5 }
  0x82   :  { %v1007_v48 = vsel %vm42_vm0, %v416_v47, 2147483647  ;;  %v376_v54 = vmul.f32 1.442695, %v375_v50  ;;  %v859_v57 = vpop.eup %858  ;;  %v173_v50 = vadd.f32 %v172_v43, %v171_v37 }
  0x83   :  { %v419_v49 = vshra.s32 %v1007_v48, 16  ;;  %v49_v60 = vsel %vm42_vm0, %v859_v57, 0.0 }
  0x84   :  { %860 = vpow2.f32 %v376_v54  ;;  %v174_v54 = vrot.slane %v173_v50, 1 }
  0x85   :  { %v1012_v51 = vcvt.s32.f32 %v419_v49 }
  0x87   :  { %422 = vmin.xlane.f32.xlu0 %v1012_v51  ;;  %v37_v52 = vpop.xlane.xlu0 %36 }
  0x88   :  { %v39_v53 = vadd.f32 0.5, %v37_v52 }
  0x8a   :  { %vm791_vm14 = vcmp.lt.s32.totalorder %v39_v53, 0  ;;  %v792_v55 = vceil.f32 %v39_v53  ;;  %v793_v56 = vfloor.f32 %v39_v53  ;;  %v861_v63 = vpop.eup %860 }
  0x8b   :  { %v378_v2 = vsel %vm42_vm0, %v861_v63, 0.0 }
  0x8c   :  { %v794_v58 = vsel %vm791_vm14, %v792_v55, %v793_v56  ;;  %v243_v55 = vmul.f32 0.5, %v939_v4 }
  0x8d   :  { %v795_v61 = vcvt.f32.s32 %v794_v58 }
  0x8f   :  { %50 = vadd.xlane.f32.xlu0 %v49_v60  ;;  %v1022_v62 = vpop.xlane.xlu0 %31  ;;  %v1056_v60 = vadd.f32 %v174_v54, %v173_v50 }
  0x90   :  { %vm38_vm15 = vcmp.gt.f32.partialorder %v1022_v62, 0.5 }
  0x91   :  { %v1025_v0 = vsel %vm38_vm15, %v795_v61, 4  ;;  %v245_v61 = vrot.slane %v243_v55, 2 }
  0x92   :  { %vm57_vm1 = vcmp.eq.s32.totalorder %v56_v38, %v1025_v0 }
  0x93   :  { %v58_v5 = vsel %vm57_vm1, %v932_v1, 0.0 }
  0x94   :  { %v59_v6 = vsel %vm42_vm0, %v58_v5, 0.0 }
  0x97   :  { %379 = vadd.xlane.f32.xlu0 %v378_v2  ;;  %v1032_v11 = vpop.xlane.xlu0 %361 }
  0x98   :  { %vm368_vm4 = vcmp.gt.f32.partialorder %v1032_v11, 0.5 }
  0x9f   :  { %60 = vadd.xlane.f32.xlu0 %v59_v6  ;;  %v367_v7 = vpop.xlane.xlu1 %366  ;;  %v92_v6 = vand.u32 65535, %v994_v41 }
  0xa0   :  { %v369_v9 = vadd.f32 0.5, %v367_v7  ;;  %v247_v7 = vsub.f32 %v939_v4, %v245_v61 }
  0xa2   :  { %vm815_vm3 = vcmp.lt.s32.totalorder %v369_v9, 0  ;;  %v816_v12 = vceil.f32 %v369_v9  ;;  %v817_v13 = vfloor.f32 %v369_v9  ;;  %v248_v9 = vadd.f32 %v245_v61, %v939_v4 }
  0xa4   :  { %v818_v14 = vsel %vm815_vm3, %v816_v12, %v817_v13  ;;  %v252_v28 = vsub.f32 %v248_v9, %v247_v7 }
  0xa5   :  { %v819_v16 = vcvt.f32.s32 %v818_v14 }
  0xa7   :  { %v1035_v17 = vsel %vm368_vm4, %v819_v16, 4  ;;  %vm122_vm4 = vcmask 24576  }
  0xa8   :  { %vm384_vm5 = vcmp.eq.s32.totalorder %v56_v38, %v1035_v17  ;;  %v158_v38 = vrot.slane %v157_v34, 4  ;;  %vm390_vm9 = vcmp.eq.s32.totalorder %v1035_v17, 4 }
  0xa9   :  { %v385_v1 = vsel %vm384_vm5, %v949_v8, 0.0  ;;  %v181_v8 = vsel %vm29_vm7, %v180_v24, 0.0  ;;  %vm63_vm5 = vcmp.eq.s32.totalorder %v1025_v0, 4 }
  0xaa   :  { %v386_v10 = vsel %vm42_vm0, %v385_v1, 0.0  ;;  %v159_v46 = vadd.f32 %v158_v38, %v157_v34 }
  0xab   :  { %387 = vadd.xlane.f32.xlu2 %v386_v10 }
  0xac   :  { %v160_v52 = vrot.slane %v159_v46, 2 }
  0xae   :  { %v161_v56 = vadd.f32 %v160_v52, %v159_v46 }
  0xb0   :  { %v162_v63 = vrot.slane %v161_v56, 1 }
  0xb2   :  { %v1064_v12 = vadd.f32 %v162_v63, %v161_v56 }
  0xb3   :  { %490 = vperm.xlu0 %854, %v1018_v59  }
  0xb7   :  { %v190_v18 = vpop.permute.xlu1 %189 }
  0xb8   :  { %v192_v20 = vmul.f32 %v190_v18, %v966_v22  ;;  %v94_v18 = vcvt.s32.f32 %v92_v6 }
  0xba   :  { %v193_v23 = vsel %vm29_vm7, %v192_v20, 0.0  ;;  %v418_v20 = vand.u32 65535, %v1007_v48 }
  0xbb   :  { %857 = vset.pattern.permute.xlu0 %v898_v26  ;;  %v194_v27 = vrot.slane %v193_v23, 4  ;;  %v182_v26 = vrot.slane %v181_v8, 4 }
  0xbc   :  { %v420_v30 = vcvt.s32.f32 %v418_v20  ;;  %v899_v20 = vmov 1.0  }
  0xbd   :  { %v195_v31 = vadd.f32 %v194_v27, %v193_v23  ;;  %v183_v36 = vadd.f32 %v182_v26, %v181_v8 }
  0xbf   :  { %v196_v35 = vrot.slane %v195_v31, 2  ;;  %v184_v42 = vrot.slane %v183_v36, 2 }
  0xc1   :  { %v197_v40 = vadd.f32 %v196_v35, %v195_v31  ;;  %v185_v49 = vadd.f32 %v184_v42, %v183_v36 }
  0xc3   :  { %v198_v47 = vrot.slane %v197_v40, 1  ;;  %v186_v22 = vrot.slane %v185_v49, 1 }
  0xc5   :  { %v1050_v53 = vadd.f32 %v198_v47, %v197_v40  ;;  %v1054_v58 = vadd.f32 %v186_v22, %v185_v49 }
  0xc7   :  { %v240_v57 = vmul.f32 0.5, %v1050_v53  ;;  %v237_v5 = vmul.f32 0.5, %v1054_v58 }
  0xc9   :  { %v241_v2 = vsub.f32 %v1056_v60, %v240_v57  ;;  %v242_v3 = vadd.f32 %v240_v57, %v1056_v60  ;;  %v238_v16 = vsub.f32 %v1064_v12, %v237_v5  ;;  %v239_v1 = vadd.f32 %v237_v5, %v1064_v12 }
  0xcb   :  { %v261_v13 = vmin.f32 %v242_v3, %v248_v9  ;;  %v262_v14 = vmax.f32 %v241_v2, %v247_v7  ;;  %v257_v23 = vmin.f32 %v239_v1, %v248_v9  ;;  %v258_v24 = vmax.f32 %v238_v16, %v247_v7 }
  0xcc   :  { %v275_v25 = vmax.f32 %v242_v3, %v248_v9  ;;  %v276_v27 = vmin.f32 %v241_v2, %v247_v7  ;;  %v250_v26 = vsub.f32 %v242_v3, %v241_v2  ;;  %v249_v35 = vsub.f32 %v239_v1, %v238_v16 }
  0xcd   :  { %v263_v41 = vsub.f32 %v261_v13, %v262_v14  ;;  %v259_v31 = vsub.f32 %v257_v23, %v258_v24  ;;  %v271_v36 = vmax.f32 %v239_v1, %v248_v9  ;;  %v272_v37 = vmin.f32 %v238_v16, %v247_v7 }
  0xce   :  { %v277_v32 = vsub.f32 %v275_v25, %v276_v27  ;;  %v251_v38 = vmul.f32 %v250_v26, %v249_v35  ;;  %v202_v14 = vsub.f32 %v1056_v60, %v939_v4  ;;  %v1098_v23 = vsel %vm390_vm9, 0.1, %v899_v20 }
  0xcf   :  { %v264_v8 = vmax.f32 %v263_v41, 0.0  ;;  %v260_v42 = vmax.f32 %v259_v31, 0.0  ;;  %v273_v47 = vsub.f32 %v271_v36, %v272_v37  ;;  %v200_v24 = vsub.f32 %v1064_v12, %v939_v4 }
  0xd0   :  { %v278_v43 = vmax.f32 %v277_v32, 0.0  ;;  %v203_v25 = vand.u32 2147483647, %v202_v14 }
  0xd1   :  { %v266_v48 = vrot.slane %v264_v8, 1  ;;  %v274_v22 = vmax.f32 %v273_v47, 0.0 }
  0xd2   :  { %v280_v50 = vrot.slane %v278_v43, 1  ;;  %v120_v43 = vrot.slane %v939_v4, 2 }
  0xd3   :  { %v1077_v46 = vmul.f32 %v266_v48, %v260_v42 }
  0xd4   :  { %v1082_v54 = vmul.f32 %v280_v50, %v274_v22 }
  0xd6   :  { %v288_v56 = vrot.slane %v1082_v54, 1 }
  0xd8   :  { %v290_v63 = vsel %vm23_vm2, %v288_v56, 1.0  ;;  %v220_v56 = vrot.slane %v939_v4, 7 }
  0xd9   :  { %v311_v3 = vrot.slane %v290_v63, 7 }
  0xdb   :  { %v324_v37 = vand.u32 2147483648, %v311_v3  ;;  %vm318_vm14 = vweird.f32 %v311_v3 }
  0xdd   :  { %v325_v22 = vor.u32 1.1754944e-38, %v324_v37 }
  0xf2   :  { %v1068_v10 = vpop.xlane.xlu2 %96 }
  0xf3   :  { %vm98_vm0 = vcmp.eq.f32.partialorder %v999_v44, %v1068_v10  ;;  %v254_v44 = vrot.slane %v252_v28, 1 }
  0xf4   :  { %v99_v19 = vsel %vm98_vm0, %v94_v18, inf }
  0xf5   :  { %100 = vmin.xlane.f32.xlu2 %v99_v19  ;;  %v256_v40 = vmul.f32 %v254_v44, %v252_v28  ;;  %v214_v28 = vsub.f32 %v1050_v53, %v939_v4 }
  0xf7   :  { %v269_v49 = vadd.f32 %v256_v40, %v251_v38  ;;  %v215_v44 = vand.u32 2147483647, %v214_v28  ;;  %v322_v40 = vand.u32 2147483647, %v311_v3 }
  0xf9   :  { %v217_v38 = vrot.slane %v215_v44, 3  ;;  %vm323_vm3 = vcmp.eq.f32.partialorder %v322_v40, 8.507059e+37 }
  0xfa   :  { %v1073_v29 = vpop.xlane.xlu0 %422 }
  0xfb   :  { %vm424_vm6 = vcmp.eq.f32.partialorder %v1012_v51, %v1073_v29  ;;  %v1080_v51 = vsub.f32 %v269_v49, %v1077_v46 }
  0xfc   :  { %v425_v34 = vsel %vm424_vm6, %v420_v30, inf  ;;  %v201_v30 = vand.u32 2147483647, %v200_v24  ;;  %v515_v24 = vpop.permute.xlu1 %514 }
  0xfd   :  { %426 = vmin.xlane.f32.xlu1 %v425_v34  ;;  %v284_v55 = vrot.slane %v1080_v51, 1 }
  0xff   :  { %v286_v57 = vsel %vm23_vm2, %v284_v55, 1.0  ;;  %vm66_vm2 = vcmask 7168  }
 0x100   :  { %v292_v2 = vrot.slane %v286_v57, 7 }
 0x102   :  { %v51_v52 = vpop.xlane.xlu0 %50  ;;  %v305_v35 = vand.u32 2147483648, %v292_v2  ;;  %vm299_vm11 = vweird.f32 %v292_v2  ;;  %v303_v48 = vand.u32 2147483647, %v292_v2 }
 0x104   :  { %v306_v42 = vor.u32 1.1754944e-38, %v305_v35  ;;  %vm304_vm1 = vcmp.eq.f32.partialorder %v303_v48, 8.507059e+37 }
 0x10a   :  { %v380_v61 = vpop.xlane.xlu0 %379 }
 0x10b   :  { %862 = vlog2.f32 %v380_v61  ;;  %v123_v61 = vsel %vm122_vm4, %v120_v43, 0.0 }
 0x10c   :  { %864 = vrcp.f32 %v292_v2 }
 0x10d   :  { %502 = vperm.xlu2 %855, %v1018_v59   ;;  %866 = vrcp.f32 %v311_v3 }
 0x10e   :  { %868 = vlog2.f32 %v51_v52  ;;  %v309_v52 = vsub.f32 %v1082_v54, %v1080_v51 }
 0x111   :  { %v863_v5 = vpop.eup %862 }
 0x112   :  { %v865_v6 = vpop.eup %864  ;;  %v382_v7 = vmul.f32 0.6931472, %v863_v5 }
 0x113   :  { %v867_v9 = vpop.eup %866  ;;  %v295_v13 = vmul.f32 %v865_v6, %v292_v2  ;;  %vm300_vm10 = vweird.f32 %v865_v6 }
 0x114   :  { %v383_v16 = vadd.f32 %v382_v7, %v1002_v45  ;;  %v314_v1 = vmul.f32 %v867_v9, %v311_v3  ;;  %vm319_vm12 = vweird.f32 %v867_v9  ;;  %vm301_vm13 = vmor %vm299_vm11, %vm300_vm10  ;;  %v869_v2 = vpop.eup %868 }
 0x115   :  { %v296_v41 = vsub.f32 1.0, %v295_v13  ;;  %vm320_vm15 = vmor %vm318_vm14, %vm319_vm12 }
 0x116   :  { %478 = vperm.xlu1 %856, %v1018_v59   ;;  %v208_v59 = vsub.f32 %v1054_v58, %v939_v4  ;;  %v315_v27 = vsub.f32 1.0, %v314_v1  ;;  %v205_v58 = vrot.slane %v203_v25, 1  ;;  %v61_v4 = vpop.xlane.xlu0 %60 }
 0x117   :  { %v297_v8 = vmul.f32 %v865_v6, %v296_v41 }
 0x118   :  { %v209_v31 = vand.u32 2147483647, %v208_v59  ;;  %v316_v26 = vmul.f32 %v867_v9, %v315_v27  ;;  %v207_v12 = vadd.f32 %v205_v58, %v201_v30  ;;  %v517_v27 = vmul.f32 %v515_v24, %v981_v33 }
 0x119   :  { %v298_v32 = vadd.f32 %v865_v6, %v297_v8  ;;  %v429_v30 = vcvt.f32.s32 %v1073_v29 }
 0x11a   :  { %v211_v34 = vrot.slane %v209_v31, 2  ;;  %v317_v36 = vadd.f32 %v867_v9, %v316_v26  ;;  %v518_v58 = vsel %vm29_vm7, %v517_v27, 0.0 }
 0x11b   :  { %v302_v53 = vsel %vm301_vm13, %v865_v6, %v298_v32  ;;  %v53_v6 = vmul.f32 0.6931472, %v869_v2  ;;  %v430_v32 = vshll.u32 %v429_v30, 16 }
 0x11c   :  { %v213_v47 = vadd.f32 %v211_v34, %v207_v12  ;;  %v321_v49 = vsel %vm320_vm15, %v867_v9, %v317_v36  ;;  %v307_v50 = vsel %vm304_vm1, %v306_v42, %v302_v53  ;;  %v519_v12 = vrot.slane %v518_v58, 4 }
 0x11d   :  { %v326_v57 = vsel %vm323_vm3, %v325_v22, %v321_v49  ;;  %v308_v63 = vmul.f32 %v307_v50, %v1077_v46  ;;  %v54_v13 = vadd.f32 %v53_v6, %v989_v39  ;;  %v404_v39 = vsel %vm66_vm2, %v1098_v23, 0.0 }
 0x11e   :  { %v388_v18 = vpop.xlane.xlu2 %387  ;;  %v219_v55 = vadd.f32 %v217_v38, %v213_v47  ;;  %v327_v5 = vmul.f32 %v326_v57, %v309_v52  ;;  %v446_v36 = vrot.slane %v957_v15, 2  ;;  %v520_v38 = vadd.f32 %v519_v12, %v518_v58 }
 0x11f   :  { %v389_v19 = vsub.f32 %v383_v16, %v388_v18  ;;  %v64_v16 = vsel %vm63_vm5, 0.1, %v899_v20  ;;  %v62_v1 = vsub.f32 %v54_v13, %v61_v4  ;;  %v103_v20 = vcvt.f32.s32 %v1068_v10 }
 0x120   :  { %v222_v3 = vmul.f32 %v220_v56, %v219_v55  ;;  %v328_v7 = vsub.f32 %v308_v63, %v327_v5  ;;  %v78_v51 = vsel %vm66_vm2, %v64_v16, 0.0  ;;  %v448_v40 = vsel %vm122_vm4, %v446_v36, 0.0 }
 0x121   :  { %v392_v60 = vmul.f32 %v1098_v23, %v389_v19  ;;  %v65_v18 = vmul.f32 %v64_v16, %v62_v1  ;;  %v521_v49 = vrot.slane %v520_v38, 2  ;;  %v568_v5 = vmul.f32 0.5, %v957_v15 }
 0x122   :  { %v224_v9 = vrot.slane %v222_v3, 3  ;;  %v329_v14 = vsub.f32 1.0, %v328_v7 }
 0x123   :  { %v393_v45 = vsel %vm66_vm2, %v392_v60, 0.0  ;;  %v67_v41 = vsel %vm66_vm2, %v65_v18, 0.0  ;;  %v104_v60 = vshll.u32 %v103_v20, 16  ;;  %v522_v57 = vadd.f32 %v521_v49, %v520_v38 }
 0x124   :  { %394 = vadd.xlane.f32.xlu0 %v393_v45  ;;  %v226_v46 = vsel %vm122_vm4, %v224_v9, 0.0  ;;  %v330_v54 = vmul.f32 %v329_v14, %v220_v56  ;;  %v570_v14 = vrot.slane %v568_v5, 2 }
 0x125   :  { %v491_v28 = vpop.permute.xlu0 %490  ;;  %v523_v52 = vrot.slane %v522_v57, 1 }
 0x126   :  { %v332_v19 = vrot.slane %v330_v54, 3  ;;  %v493_v31 = vmul.f32 %v491_v28, %v981_v33  ;;  %v572_v18 = vsub.f32 %v957_v15, %v570_v14 }
 0x127   :  { %v524_v3 = vadd.f32 %v523_v52, %v522_v57 }
 0x128   :  { %v334_v59 = vsel %vm122_vm4, %v332_v19, 0.0  ;;  %v494_v29 = vsel %vm29_vm7, %v493_v31, 0.0  ;;  %v573_v19 = vadd.f32 %v957_v15, %v570_v14 }
 0x129   :  { %v495_v53 = vrot.slane %v494_v29, 4  ;;  %v565_v9 = vmul.f32 0.5, %v524_v3 }
 0x12a   :  { %v577_v30 = vsub.f32 %v573_v19, %v572_v18 }
 0x12b   :  { %v496_v50 = vadd.f32 %v495_v53, %v494_v29 }
 0x136   :  { %124 = vadd.xlane.f32.xlu2 %v123_v61  ;;  %v497_v61 = vrot.slane %v496_v50, 2 }
 0x138   :  { %v498_v2 = vadd.f32 %v497_v61, %v496_v50  ;;  %v545_v61 = vrot.slane %v957_v15, 7 }
 0x13e   :  { %227 = vadd.xlane.f32.xlu2 %v226_v46 }
 0x140   :  { %79 = vadd.xlane.f32.xlu1 %v78_v51 }
 0x146   :  { %68 = vadd.xlane.f32.xlu2 %v67_v41 }
 0x148   :  { %335 = vadd.xlane.f32.xlu1 %v334_v59 }
 0x14e   :  { %405 = vadd.xlane.f32.xlu2 %v404_v39 }
 0x168   :  { %v101_v25 = vpop.xlane.xlu2 %100 }
 0x169   :  { %v102_v45 = vcvt.f32.s32 %v101_v25 }
 0x16b   :  { %v105_v8 = vadd.s32 %v104_v60, %v102_v45 }
 0x16d   :  { %vm106_vm0 = vcmp.ne.s32.totalorder %v105_v8, 4  ;;  %vm136_vm6 = vcmp.eq.s32.totalorder %v105_v8, %v1025_v0  ;;  %v539_v8 = vsub.f32 %v524_v3, %v957_v15 }
 0x16e   :  { %v781_v23 = vsel %vm106_vm0, 1.0, %v896_v21  ;;  %v137_v10 = vsel %vm136_vm6, 1.0, %v896_v21 }
 0x16f   :  { %v109_v26 = vsel %vm66_vm2, %v781_v23, 0.0  ;;  %v138_v44 = vmul.f32 %v137_v10, %v1022_v62 }
 0x170   :  { %v427_v34 = vpop.xlane.xlu1 %426  ;;  %110 = vadd.xlane.f32.xlu0 %v109_v26  ;;  %v503_v0 = vpop.permute.xlu2 %502 }
 0x171   :  { %v428_v35 = vcvt.f32.s32 %v427_v34  ;;  %v139_v48 = vsel %vm66_vm2, %v138_v44, 0.0  ;;  %v505_v62 = vmul.f32 %v503_v0, %v981_v33 }
 0x172   :  { %140 = vadd.xlane.f32.xlu1 %v139_v48  ;;  %v579_v48 = vrot.slane %v577_v30, 1 }
 0x173   :  { %v431_v37 = vadd.s32 %v430_v32, %v428_v35  ;;  %v506_v56 = vsel %vm29_vm7, %v505_v62, 0.0  ;;  %v540_v35 = vand.u32 2147483647, %v539_v8 }
 0x175   :  { %vm432_vm9 = vcmp.ne.s32.totalorder %v431_v37, 4  ;;  %vm461_vm10 = vcmp.eq.s32.totalorder %v431_v37, %v1035_v17  ;;  %v507_v17 = vrot.slane %v506_v56, 4  ;;  %v542_v57 = vrot.slane %v540_v35, 3 }
 0x176   :  { %v785_v42 = vsel %vm432_vm9, 1.0, %v896_v21  ;;  %v462_v43 = vsel %vm461_vm10, 1.0, %v896_v21 }
 0x177   :  { %v463_v47 = vmul.f32 %v462_v43, %v1032_v11  ;;  %v435_v22 = vsel %vm66_vm2, %v785_v42, 0.0  ;;  %v508_v63 = vadd.f32 %v507_v17, %v506_v56  ;;  %v499_v11 = vrot.slane %v498_v2, 1 }
 0x178   :  { %449 = vadd.xlane.f32.xlu0 %v448_v40 }
 0x179   :  { %v464_v55 = vsel %vm66_vm2, %v463_v47, 0.0  ;;  %v509_v21 = vrot.slane %v508_v63, 2  ;;  %v500_v4 = vadd.f32 %v499_v11, %v498_v2 }
 0x17a   :  { %436 = vadd.xlane.f32.xlu1 %v435_v22  ;;  %465 = vadd.xlane.f32.xlu2 %v464_v55  ;;  %v581_v22 = vmul.f32 %v579_v48, %v577_v30 }
 0x17b   :  { %v510_v6 = vadd.f32 %v509_v21, %v508_v63  ;;  %v566_v51 = vsub.f32 %v500_v4, %v565_v9  ;;  %v567_v54 = vadd.f32 %v565_v9, %v500_v4  ;;  %v527_v60 = vsub.f32 %v500_v4, %v957_v15 }
 0x17d   :  { %v511_v1 = vrot.slane %v510_v6, 1  ;;  %v586_v20 = vmin.f32 %v567_v54, %v573_v19  ;;  %v587_v24 = vmax.f32 %v566_v51, %v572_v18  ;;  %v601_v27 = vmin.f32 %v566_v51, %v572_v18 }
 0x17e   :  { %v528_v10 = vand.u32 2147483647, %v527_v60  ;;  %v575_v29 = vsub.f32 %v567_v54, %v566_v51 }
 0x17f   :  { %v512_v59 = vadd.f32 %v511_v1, %v510_v6  ;;  %v588_v58 = vsub.f32 %v586_v20, %v587_v24 }
 0x180   :  { %v530_v38 = vrot.slane %v528_v10, 1 }
 0x181   :  { %v533_v45 = vsub.f32 %v512_v59, %v957_v15  ;;  %v562_v31 = vmul.f32 0.5, %v512_v59  ;;  %v589_v36 = vmax.f32 %v588_v58, 0.0 }
 0x183   :  { %v534_v34 = vand.u32 2147483647, %v533_v45  ;;  %v591_v52 = vrot.slane %v589_v36, 1 }
 0x185   :  { %v536_v49 = vrot.slane %v534_v34, 2 }
 0x188   :  { %v479_v7 = vpop.permute.xlu1 %478 }
 0x189   :  { %v481_v13 = vmul.f32 %v479_v7, %v981_v33  ;;  %v600_v33 = vmax.f32 %v567_v54, %v573_v19 }
 0x18b   :  { %v482_v16 = vsel %vm29_vm7, %v481_v13, 0.0  ;;  %v602_v26 = vsub.f32 %v600_v33, %v601_v27 }
 0x18c   :  { %v483_v46 = vrot.slane %v482_v16, 4 }
 0x18d   :  { %v603_v43 = vmax.f32 %v602_v26, 0.0 }
 0x18e   :  { %v484_v41 = vadd.f32 %v483_v46, %v482_v16 }
 0x18f   :  { %v605_v21 = vrot.slane %v603_v43, 1 }
 0x190   :  { %v485_v39 = vrot.slane %v484_v41, 2 }
 0x192   :  { %v486_v25 = vadd.f32 %v485_v39, %v484_v41 }
 0x194   :  { %v487_v28 = vrot.slane %v486_v25, 1 }
 0x196   :  { %v488_v23 = vadd.f32 %v487_v28, %v486_v25 }
 0x198   :  { %v563_v44 = vsub.f32 %v488_v23, %v562_v31  ;;  %v564_v32 = vadd.f32 %v562_v31, %v488_v23  ;;  %v525_v12 = vsub.f32 %v488_v23, %v957_v15 }
 0x19a   :  { %v574_v0 = vsub.f32 %v564_v32, %v563_v44  ;;  %v526_v37 = vand.u32 2147483647, %v525_v12  ;;  %v582_v53 = vmin.f32 %v564_v32, %v573_v19  ;;  %v583_v40 = vmax.f32 %v563_v44, %v572_v18 }
 0x19b   :  { %v596_v62 = vmax.f32 %v564_v32, %v573_v19  ;;  %v597_v42 = vmin.f32 %v563_v44, %v572_v18 }
 0x19c   :  { %v532_v47 = vadd.f32 %v530_v38, %v526_v37  ;;  %v576_v50 = vmul.f32 %v575_v29, %v574_v0  ;;  %v584_v55 = vsub.f32 %v582_v53, %v583_v40 }
 0x19d   :  { %v598_v56 = vsub.f32 %v596_v62, %v597_v42 }
 0x19e   :  { %v538_v17 = vadd.f32 %v536_v49, %v532_v47  ;;  %v585_v63 = vmax.f32 %v584_v55, 0.0  ;;  %v594_v5 = vadd.f32 %v581_v22, %v576_v50 }
 0x19f   :  { %v599_v2 = vmax.f32 %v598_v56, 0.0 }
 0x1a0   :  { %v544_v3 = vadd.f32 %v542_v57, %v538_v17  ;;  %v593_v11 = vmul.f32 %v591_v52, %v585_v63  ;;  %v395_v63 = vpop.xlane.xlu0 %394 }
 0x1a1   :  { %v607_v6 = vmul.f32 %v605_v21, %v599_v2 }
 0x1a2   :  { %v547_v7 = vmul.f32 %v545_v61, %v544_v3  ;;  %v595_v9 = vsub.f32 %v594_v5, %v593_v11 }
 0x1a3   :  { %v613_v4 = vrot.slane %v607_v6, 1 }
 0x1a4   :  { %v549_v13 = vrot.slane %v547_v7, 3  ;;  %v609_v14 = vrot.slane %v595_v9, 1  ;;  %v634_v48 = vsub.f32 %v607_v6, %v595_v9  ;;  %v396_v6 = vrot.slane %v395_v63, 4 }
 0x1a5   :  { %v615_v16 = vsel %vm354_vm8, %v613_v4, 1.0 }
 0x1a6   :  { %v551_v1 = vsel %vm122_vm4, %v549_v13, 0.0  ;;  %v636_v46 = vrot.slane %v615_v16, 7  ;;  %v611_v51 = vsel %vm354_vm8, %v609_v14, 1.0  ;;  %v397_v13 = vadd.f32 %v396_v6, %v395_v63 }
 0x1a7   :  { %552 = vadd.xlane.f32.xlu1 %v551_v1  ;;  %v617_v54 = vrot.slane %v611_v51, 7 }
 0x1a8   :  { %870 = vrcp.f32 %v636_v46  ;;  %v649_v25 = vand.u32 2147483648, %v636_v46  ;;  %v647_v45 = vand.u32 2147483647, %v636_v46  ;;  %vm643_vm2 = vweird.f32 %v636_v46 }
 0x1a9   :  { %v125_v18 = vpop.xlane.xlu2 %124  ;;  %872 = vrcp.f32 %v617_v54  ;;  %v630_v8 = vand.u32 2147483648, %v617_v54  ;;  %v628_v58 = vand.u32 2147483647, %v617_v54  ;;  %vm624_vm12 = vweird.f32 %v617_v54 }
 0x1aa   :  { %v650_v10 = vor.u32 1.1754944e-38, %v649_v25  ;;  %vm648_vm13 = vcmp.eq.f32.partialorder %v647_v45, 8.507059e+37  ;;  %v126_v52 = vrot.slane %v125_v18, 4 }
 0x1ab   :  { %v631_v32 = vor.u32 1.1754944e-38, %v630_v8  ;;  %vm629_vm15 = vcmp.eq.f32.partialorder %v628_v58, 8.507059e+37 }
 0x1ae   :  { %v871_v19 = vpop.eup %870 }
 0x1af   :  { %v639_v41 = vmul.f32 %v871_v19, %v636_v46  ;;  %v873_v59 = vpop.eup %872  ;;  %vm644_vm7 = vweird.f32 %v871_v19 }
 0x1b0   :  { %v620_v20 = vmul.f32 %v873_v59, %v617_v54  ;;  %vm625_vm8 = vweird.f32 %v873_v59  ;;  %vm645_vm11 = vmor %vm643_vm2, %vm644_vm7 }
 0x1b1   :  { %v228_v39 = vpop.xlane.xlu2 %227  ;;  %v640_v24 = vsub.f32 1.0, %v639_v41  ;;  %vm626_vm14 = vmor %vm624_vm12, %vm625_vm8 }
 0x1b2   :  { %v621_v33 = vsub.f32 1.0, %v620_v20  ;;  %v229_v21 = vrot.slane %v228_v39, 4 }
 0x1b3   :  { %v80_v60 = vpop.xlane.xlu1 %79  ;;  %v641_v27 = vmul.f32 %v871_v19, %v640_v24 }
 0x1b4   :  { %v81_v28 = vrot.slane %v80_v60, 4  ;;  %v622_v30 = vmul.f32 %v873_v59, %v621_v33  ;;  %v230_v15 = vadd.f32 %v229_v21, %v228_v39 }
 0x1b5   :  { %v642_v31 = vadd.f32 %v871_v19, %v641_v27 }
 0x1b6   :  { %v82_v23 = vadd.f32 %v81_v28, %v80_v60  ;;  %v623_v26 = vadd.f32 %v873_v59, %v622_v30  ;;  %v231_v16 = vrot.slane %v230_v15, 2 }
 0x1b7   :  { %v646_v44 = vsel %vm645_vm11, %v871_v19, %v642_v31 }
 0x1b8   :  { %v651_v12 = vsel %vm648_vm13, %v650_v10, %v646_v44  ;;  %v83_v34 = vrot.slane %v82_v23, 2  ;;  %v627_v35 = vsel %vm626_vm14, %v873_v59, %v623_v26  ;;  %v398_v59 = vrot.slane %v397_v13, 2 }
 0x1b9   :  { %v69_v29 = vpop.xlane.xlu2 %68  ;;  %v632_v0 = vsel %vm629_vm15, %v631_v32, %v627_v35  ;;  %v652_v38 = vmul.f32 %v651_v12, %v634_v48  ;;  %v232_v25 = vadd.f32 %v231_v16, %v230_v15 }
 0x1ba   :  { %v70_v36 = vrot.slane %v69_v29, 4  ;;  %v633_v37 = vmul.f32 %v632_v0, %v593_v11  ;;  %v84_v62 = vadd.f32 %v83_v34, %v82_v23  ;;  %v127_v11 = vadd.f32 %v126_v52, %v125_v18 }
 0x1bb   :  { %v336_v2 = vpop.xlane.xlu1 %335  ;;  %v399_v58 = vadd.f32 %v398_v59, %v397_v13  ;;  %v233_v10 = vrot.slane %v232_v25, 1 }
 0x1bc   :  { %v71_v53 = vadd.f32 %v70_v36, %v69_v29  ;;  %v653_v40 = vsub.f32 %v633_v37, %v652_v38  ;;  %v85_v50 = vrot.slane %v84_v62, 1  ;;  %v337_v5 = vrot.slane %v336_v2, 4 }
 0x1bd   :  { %v128_v7 = vrot.slane %v127_v11, 2  ;;  %v400_v38 = vrot.slane %v399_v58, 1 }
 0x1be   :  { %v72_v42 = vrot.slane %v71_v53, 2  ;;  %v654_v43 = vsub.f32 1.0, %v653_v40  ;;  %v86_v57 = vadd.f32 %v85_v50, %v84_v62  ;;  %v338_v9 = vadd.f32 %v337_v5, %v336_v2 }
 0x1bf   :  { %v129_v41 = vadd.f32 %v128_v7, %v127_v11 }
 0x1c0   :  { %v73_v47 = vadd.f32 %v72_v42, %v71_v53  ;;  %v655_v49 = vmul.f32 %v654_v43, %v545_v61  ;;  %v339_v19 = vrot.slane %v338_v9, 2  ;;  %v234_v43 = vadd.f32 %v233_v10, %v232_v25 }
 0x1c1   :  { %v406_v3 = vpop.xlane.xlu2 %405  ;;  %v130_v27 = vrot.slane %v129_v41, 1 }
 0x1c2   :  { %v74_v22 = vrot.slane %v73_v47, 1  ;;  %v657_v55 = vrot.slane %v655_v49, 3  ;;  %v407_v61 = vrot.slane %v406_v3, 4  ;;  %v340_v45 = vadd.f32 %v339_v19, %v338_v9 }
 0x1c3   :  { %v131_v29 = vadd.f32 %v130_v27, %v129_v41 }
 0x1c4   :  { %v75_v56 = vadd.f32 %v74_v22, %v73_v47  ;;  %v659_v17 = vsel %vm122_vm4, %v657_v55, 0.0  ;;  %v408_v1 = vadd.f32 %v407_v61, %v406_v3  ;;  %v341_v48 = vrot.slane %v340_v45, 1 }
 0x1c5   :  { %660 = vadd.xlane.f32.xlu0 %v659_v17  ;;  %v401_v22 = vadd.f32 %v400_v38, %v399_v58 }
 0x1c6   :  { %796 = vpush %v75_v56  ;;  %v409_v18 = vrot.slane %v408_v1, 2  ;;  %v342_v49 = vadd.f32 %v341_v48, %v340_v45 }
 0x1c7   :  { %798 = vpush %v86_v57 }
 0x1c8   :  { %v410_v26 = vadd.f32 %v409_v18, %v408_v1 }
 0x1ca   :  { %v411_v40 = vrot.slane %v410_v26, 1 }
 0x1cc   :  { %v412_v56 = vadd.f32 %v411_v40, %v410_v26 }
 0x1e3   :  { %v111_v4 = vpop.xlane.xlu0 %110 }
 0x1e4   :  { %v112_v14 = vrot.slane %v111_v4, 4 }
 0x1e5   :  { %v141_v46 = vpop.xlane.xlu1 %140 }
 0x1e6   :  { %v113_v51 = vadd.f32 %v112_v14, %v111_v4  ;;  %v142_v54 = vrot.slane %v141_v46, 4  ;;  %v901_v4 = vmov 2.0  }
 0x1e8   :  { %v114_v20 = vrot.slane %v113_v51, 2  ;;  %v143_v24 = vadd.f32 %v142_v54, %v141_v46 }
 0x1ea   :  { %v144_v60 = vrot.slane %v143_v24, 2  ;;  %v115_v39 = vadd.f32 %v114_v20, %v113_v51 }
 0x1eb   :  { %v450_v33 = vpop.xlane.xlu0 %449 }
 0x1ec   :  { %v451_v28 = vrot.slane %v450_v33, 4  ;;  %v116_v8 = vrot.slane %v115_v39, 1  ;;  %v145_v30 = vadd.f32 %v144_v60, %v143_v24 }
 0x1ed   :  { %v437_v31 = vpop.xlane.xlu1 %436  ;;  %v466_v23 = vpop.xlane.xlu2 %465 }
 0x1ee   :  { %v452_v44 = vadd.f32 %v451_v28, %v450_v33  ;;  %v438_v32 = vrot.slane %v437_v31, 4  ;;  %v467_v12 = vrot.slane %v466_v23, 4  ;;  %v117_v34 = vadd.f32 %v116_v8, %v115_v39 }
 0x1ef   :  { %v146_v35 = vrot.slane %v145_v30, 1 }
 0x1f0   :  { %v453_v36 = vrot.slane %v452_v44, 2  ;;  %v439_v0 = vadd.f32 %v438_v32, %v437_v31  ;;  %v468_v37 = vadd.f32 %v467_v12, %v466_v23  ;;  %800 = vpush %v117_v34 }
 0x1f1   :  { %802 = vpush %v131_v29  ;;  %v147_v53 = vadd.f32 %v146_v35, %v145_v30 }
 0x1f2   :  { %v440_v62 = vrot.slane %v439_v0, 2  ;;  %v469_v42 = vrot.slane %v468_v37, 2  ;;  %v454_v47 = vadd.f32 %v453_v36, %v452_v44 }
 0x1f3   :  { %804 = vpush %v147_v53 }
 0x1f4   :  { %v470_v50 = vadd.f32 %v469_v42, %v468_v37  ;;  %806 = vpush %v234_v43  ;;  %v441_v55 = vadd.f32 %v440_v62, %v439_v0  ;;  %v455_v17 = vrot.slane %v454_v47, 1 }
 0x1f5   :  { %808 = vpush %v342_v49 }
 0x1f6   :  { %820 = vpush %v401_v22  ;;  %v442_v57 = vrot.slane %v441_v55, 1  ;;  %v471_v63 = vrot.slane %v470_v50, 1  ;;  %v456_v21 = vadd.f32 %v455_v17, %v454_v47 }
 0x1f7   :  { %822 = vpush %v412_v56  ;;  %s1162_s22 = spop %796 }
 0x1f8   :  { %v443_v52 = vadd.f32 %v442_v57, %v441_v55  ;;  %v472_v2 = vadd.f32 %v471_v63, %v470_v50  ;;  %s799_s23 = spop %798 }
 0x1fa   :  { %824 = vpush %v443_v52 }
 0x1fb   :  { %826 = vpush %v456_v21 }
 0x1fc   :  { %828 = vpush %v472_v2 }
 0x21a   :  { %v553_v3 = vpop.xlane.xlu1 %552 }
 0x21b   :  { %v554_v11 = vrot.slane %v553_v3, 4 }
 0x21d   :  { %v555_v5 = vadd.f32 %v554_v11, %v553_v3 }
 0x21f   :  { %v556_v6 = vrot.slane %v555_v5, 2 }
 0x221   :  { %v557_v15 = vadd.f32 %v556_v6, %v555_v5  ;;  %s801_s24 = spop %800 }
 0x222   :  { %s803_s25 = spop %802 }
 0x223   :  { %s133_s26 = ssub.f32 %s801_s24, %s803_s25  ;;  %v558_v61 = vrot.slane %v557_v15, 1 }
 0x224   :  { %s1164_s27 = spop %804 }
 0x225   :  { %s1166_s28 = spop %806  ;;  %v559_v7 = vadd.f32 %v558_v61, %v557_v15  ;;  %s1174_s11 = sand.u32 2147483647, %s133_s26 }
 0x226   :  { %s1168_s29 = spop %808 }
 0x227   :  { %s1170_s30 = spop %820  ;;  %830 = vpush %v559_v7 }
 0x228   :  { %s403_s4 = sadd.f32 %s1170_s30, %s1162_s22  ;;  %s823_s5 = spop %822 }
 0x229   :  { %s414_s6 = sadd.f32 %s823_s5, %s799_s23 }
 0x22b   :  { %v671_v9 = vstv %s414_s6  ;;  %s825_s7 = spop %824 }
 0x22c   :  { %874 = vrcp.f32 %v671_v9  ;;  %s827_s8 = spop %826  ;;  %v683_v28 = vand.u32 2147483648, %v671_v9  ;;  %vm677_vm4 = vweird.f32 %v671_v9  ;;  %v681_v30 = vand.u32 2147483647, %v671_v9 }
 0x22d   :  { %s458_s9 = ssub.f32 %s825_s7, %s827_s8  ;;  %876 = vrcp.f32 %v901_v4  ;;  %s829_s16 = spop %828 }
 0x22e   :  { %s475_s10 = sadd.f32 %s827_s8, %s803_s25  ;;  %v684_v32 = vor.u32 1.1754944e-38, %v683_v28  ;;  %vm682_vm10 = vcmp.eq.f32.partialorder %v681_v30, 8.507059e+37 }
 0x22f   :  { %s1176_s12 = sand.u32 2147483647, %s458_s9  ;;  %s474_s17 = sadd.f32 %s829_s16, %s1164_s27 }
 0x230   :  { %s670_s14 = smax.f32 %s902_s13, %s475_s10  ;;  %s460_s15 = sadd.f32 %s1176_s12, %s1174_s11 }
 0x231   :  { %v691_v13 = vstv %s670_s14  ;;  %s690_s0 = smul.f32 100.0, %s474_s17  ;;  %s903_s9 = smov [#allocation2]  }
 0x232   :  { %v875_v14 = vpop.eup %874  ;;  %878 = vrcp.f32 %v691_v13  ;;  %v703_v58 = vand.u32 2147483648, %v691_v13  ;;  %vm697_vm0 = vweird.f32 %v691_v13  ;;  %v701_v23 = vand.u32 2147483647, %v691_v13 }
 0x233   :  { %v877_v16 = vpop.eup %876  ;;  %v673_v1 = vmul.f32 %v875_v14, %v671_v9  ;;  %vm678_vm1 = vweird.f32 %v875_v14 }
 0x234   :  { %v712_v46 = vmul.f32 2.0, %v877_v16  ;;  %vm679_vm5 = vmor %vm677_vm4, %vm678_vm1  ;;  %vm716_vm9 = vweird.f32 %v877_v16  ;;  %v704_v34 = vor.u32 1.1754944e-38, %v703_v58  ;;  %vm702_vm7 = vcmp.eq.f32.partialorder %v701_v23, 8.507059e+37 }
 0x235   :  { %v674_v51 = vsub.f32 1.0, %v673_v1 }
 0x236   :  { %v713_v20 = vsub.f32 1.0, %v712_v46 }
 0x237   :  { %v675_v18 = vmul.f32 %v875_v14, %v674_v51 }
 0x238   :  { %v879_v54 = vpop.eup %878  ;;  %v661_v41 = vpop.xlane.xlu0 %660  ;;  %v714_v33 = vmul.f32 %v877_v16, %v713_v20 }
 0x239   :  { %v693_v19 = vmul.f32 %v879_v54, %v691_v13  ;;  %v662_v59 = vrot.slane %v661_v41, 4  ;;  %v676_v27 = vadd.f32 %v875_v14, %v675_v18  ;;  %vm698_vm3 = vweird.f32 %v879_v54 }
 0x23a   :  { %v715_v10 = vadd.f32 %v877_v16, %v714_v33  ;;  %vm699_vm6 = vmor %vm697_vm0, %vm698_vm3 }
 0x23b   :  { %v694_v24 = vsub.f32 1.0, %v693_v19  ;;  %v663_v25 = vadd.f32 %v662_v59, %v661_v41  ;;  %v680_v26 = vsel %vm679_vm5, %v875_v14, %v676_v27 }
 0x23c   :  { %v685_v29 = vsel %vm682_vm10, %v684_v32, %v680_v26  ;;  %v717_v35 = vsel %vm716_vm9, %v877_v16, %v715_v10 }
 0x23d   :  { %v695_v60 = vmul.f32 %v879_v54, %v694_v24  ;;  %v664_v39 = vrot.slane %v663_v25, 2 }
 0x23f   :  { %v665_v45 = vadd.f32 %v664_v39, %v663_v25  ;;  %v696_v8 = vadd.f32 %v879_v54, %v695_v60 }
 0x241   :  { %v666_v31 = vrot.slane %v665_v45, 1  ;;  %v700_v12 = vsel %vm699_vm6, %v879_v54, %v696_v8 }
 0x242   :  { %v705_v48 = vsel %vm702_vm7, %v704_v34, %v700_v12 }
 0x243   :  { %v667_v44 = vadd.f32 %v666_v31, %v665_v45 }
 0x245   :  { %832 = vpush %v667_v44 }
 0x246   :  { %834 = vpush %v685_v29 }
 0x247   :  { %836 = vpush %v705_v48 }
 0x248   :  { %838 = vpush %v717_v35 }
 0x258   :  { %s831_s21 = spop %830 }
 0x259   :  { %s561_s2 = sadd.f32 %s831_s21, %s1166_s28 }
 0x276   :  { %s833_s1 = spop %832 }
 0x277   :  { %s669_s23 = sadd.f32 %s833_s1, %s1168_s29  ;;  %s835_s24 = spop %834 }
 0x278   :  { %s687_s25 = smul.f32 %s835_s24, %s403_s4  ;;  %s837_s26 = spop %836 }
 0x279   :  { %s707_s5 = smul.f32 %s837_s26, %s690_s0  ;;  %s839_s6 = spop %838 }
 0x27a   :  { %689 = sst [smem:[#allocation2]] %s687_s25  ;;  %s738_s27 = smul.f32 %s837_s26, %s561_s2 }
 0x27b   :  { %s708_s7 = ssub.f32 100.0, %s707_s5  ;;  %s757_s8 = smul.f32 %s837_s26, %s669_s23 }
 0x27c   :  { %740 = sst [smem:[#allocation2 + $0x3]] %s738_s27  ;;  %s719_s3 = smul.f32 %s839_s6, %s460_s15 }
 0x27d   :  { %710 = sst [smem:[#allocation2 + $0x1]] %s708_s7 }
 0x27e   :  { %759 = sst [smem:[#allocation2 + $0x4]] %s757_s8 }
 0x27f   :  { %721 = sst [smem:[#allocation2 + $0x2]] %s719_s3 }
 0x280   :  { %774 = dma.smem_to_vmem %s903_s9, 16, %s772_s20, [#allocation3]  }
 0x281   :  { %892 = dma.done.wait [#allocation3], 16  }
 0x282   :  { %893 = vsyncadd [#allocation3], 4294967280 }
 0x283   :  { %779 = sfence }
 0x284   :  { %780 = vsyncpa [#allocation3], 1 }

</bundles_post_ra>
